<compile_context>
chip_gen: v6e
topology: v6e:2x2x1
jax: 0.10.0
libtpu: 0.0.40
codegen_flags: <defaults>
</compile_context>

<pallas_src>
import jax
import jax.numpy as jnp
from jax.experimental import pallas as pl
from jax.experimental.pallas import tpu as pltpu


def _round_up(x, m):
    return ((x + m - 1) // m) * m


# ----------------------------------------------------------------------------- kernel
def sentence_decoder_kernel(x_ref, h_ref, c_ref, wih_ref, whh_ref, b_ref,
                            wfc_ref, bfc_ref,
                            pred_ref, h_out_ref, c_out_ref, h_bf16_scr):
    """Grid axis = vocab tiles ('arbitrary' -> sequential on one TensorCore).

    Grid step 0 computes the LSTM cell once and parks h' (bf16) in VMEM scratch;
    every grid step computes one (B, TN) tile of the fc head from the resident h'
    while the next w_fc tile streams in.
    """
    H = c_ref.shape[-1]

    @pl.when(pl.program_id(0) == 0)
    def _():
        # Two tiny gate matmuls (contraction dims E and H), f32 accumulate on MXU.
        gates = (jnp.dot(x_ref[...].astype(jnp.bfloat16), wih_ref[...],
                         preferred_element_type=jnp.float32)
                 + jnp.dot(h_ref[...].astype(jnp.bfloat16), whh_ref[...],
                           preferred_element_type=jnp.float32)
                 + b_ref[...])

        # H is a multiple of 128 -> lane-aligned slices (no cross-tile relayouts).
        i_g = jax.nn.sigmoid(gates[:, 0 * H:1 * H])
        f_g = jax.nn.sigmoid(gates[:, 1 * H:2 * H])
        g_g = jnp.tanh(gates[:, 2 * H:3 * H])
        o_g = jax.nn.sigmoid(gates[:, 3 * H:4 * H])

        c_new = f_g * c_ref[...] + i_g * g_g
        h_new = o_g * jnp.tanh(c_new)

        c_out_ref[...] = c_new
        h_out_ref[...] = h_new
        h_bf16_scr[...] = h_new.astype(jnp.bfloat16)   # carried across vocab tiles

    # fc head tile: (B, H) bf16 @ (H, TN) bf16 -> f32, + (1, TN) bias
    pred_ref[...] = (jnp.dot(h_bf16_scr[...], wfc_ref[...],
                             preferred_element_type=jnp.float32)
                     + bfc_ref[...])


# ----------------------------------------------------------------------------- wrapper
def pack_params(params, *, max_vocab_tile=2048, weights_dtype=jnp.bfloat16):
    """One-time weight packing: transpose to (in, out), pad/tile the fc head.

    Vocab tile selection:
      * small vocab (Vp <= max_vocab_tile): single tile, grid=(1,) -> no
        per-grid-step overhead around a trivially small matmul.
      * large vocab: stream max_vocab_tile-wide (multiple of 128) tiles; at
        H=256 bf16 that is >=1 MiB per DMA (near HBM roofline) and keeps the
        double-buffered w_fc tile comfortably inside every chip's scoped VMEM.
    """
    four_h, E = params["w_ih"].shape
    H = params["w_hh"].shape[1]
    V = params["w_fc"].shape[0]
    assert four_h == 4 * H
    assert H % 128 == 0, "gate slicing assumes lane-aligned hidden dim"
    assert max_vocab_tile % 128 == 0

    Vp0 = _round_up(V, 128)
    if Vp0 <= max_vocab_tile:
        TN, Vp = Vp0, Vp0                  # single-tile fast path
    else:
        TN = max_vocab_tile
        Vp = _round_up(V, TN)

    wih = params["w_ih"].T.astype(weights_dtype)                         # (E, 4H)
    whh = params["w_hh"].T.astype(weights_dtype)                         # (H, 4H)
    b = (params["b_ih"] + params["b_hh"]).reshape(1, 4 * H).astype(jnp.float32)

    wfc = jnp.pad(params["w_fc"].T, ((0, 0), (0, Vp - V))).astype(weights_dtype)  # (H, Vp)
    bfc = jnp.pad(params["b_fc"].reshape(1, V),
                  ((0, 0), (0, Vp - V))).astype(jnp.float32)                      # (1, Vp)

    return {"wih": wih, "whh": whh, "b": b, "wfc": wfc, "bfc": bfc,
            "embed_dim": E, "hidden_dim": H, "vocab_size": V,
            "vocab_tile": TN}


def sentence_decoder_forward(sentence, h, c, packed):
    """One LSTMCell step + vocab-tiled Linear head in a single pallas_call."""
    B, E = sentence.shape
    H = h.shape[-1]
    Vp = packed["wfc"].shape[1]
    V = packed["vocab_size"]
    TN = packed["vocab_tile"]
    nt = Vp // TN

    pred, h_new, c_new = pl.pallas_call(
        sentence_decoder_kernel,
        grid=(nt,),
        in_specs=[
            pl.BlockSpec((B, E), lambda j: (0, 0)),         # sentence  (resident)
            pl.BlockSpec((B, H), lambda j: (0, 0)),         # h         (resident)
            pl.BlockSpec((B, H), lambda j: (0, 0)),         # c         (resident)
            pl.BlockSpec((E, 4 * H), lambda j: (0, 0)),     # W_ih^T    (resident)
            pl.BlockSpec((H, 4 * H), lambda j: (0, 0)),     # W_hh^T    (resident)
            pl.BlockSpec((1, 4 * H), lambda j: (0, 0)),     # b_ih+b_hh (resident)
            pl.BlockSpec((H, TN), lambda j: (0, j)),        # fc weight tile (streamed)
            pl.BlockSpec((1, TN), lambda j: (0, j)),        # fc bias tile
        ],
        out_specs=(
            pl.BlockSpec((B, TN), lambda j: (0, j)),        # pred tile (lane-dense)
            pl.BlockSpec((B, H), lambda j: (0, 0)),         # h'
            pl.BlockSpec((B, H), lambda j: (0, 0)),         # c'
        ),
        out_shape=(
            jax.ShapeDtypeStruct((B, Vp), jnp.float32),
            jax.ShapeDtypeStruct((B, H), jnp.float32),
            jax.ShapeDtypeStruct((B, H), jnp.float32),
        ),
        scratch_shapes=[pltpu.VMEM((B, H), jnp.bfloat16)],  # h' carried across tiles
        compiler_params=pltpu.CompilerParams(
            dimension_semantics=("arbitrary",)),
    )(sentence, h, c, packed["wih"], packed["whh"], packed["b"],
      packed["wfc"], packed["bfc"])

    return pred[:, :V], h_new, c_new


# ----------------------------------------------------------------------------- refs
def init_params(key, embed_dim, hidden_dim, vocab_size):
    ks = jax.random.split(key, 6)
    s = 0.05
    return {
        "w_ih": s * jax.random.normal(ks[0], (4 * hidden_dim, embed_dim), jnp.float32),
        "w_hh": s * jax.random.normal(ks[1], (4 * hidden_dim, hidden_dim), jnp.float32),
        "b_ih": s * jax.random.normal(ks[2], (4 * hidden_dim,), jnp.float32),
        "b_hh": s * jax.random.normal(ks[3], (4 * hidden_dim,), jnp.float32),
        "w_fc": s * jax.random.normal(ks[4], (vocab_size, hidden_dim), jnp.float32),
        "b_fc": s * jax.random.normal(ks[5], (vocab_size,), jnp.float32),
    }


def reference_forward_f32(sentence, h, c, p):
    """Pure f32 PyTorch-semantics reference."""
    gates = sentence @ p["w_ih"].T + p["b_ih"] + h @ p["w_hh"].T + p["b_hh"]
    H = h.shape[-1]
    i = jax.nn.sigmoid(gates[:, 0 * H:1 * H])
    f = jax.nn.sigmoid(gates[:, 1 * H:2 * H])
    g = jnp.tanh(gates[:, 2 * H:3 * H])
    o = jax.nn.sigmoid(gates[:, 3 * H:4 * H])
    c_new = f * c + i * g
    h_new = o * jnp.tanh(c_new)
    pred = h_new @ p["w_fc"].T + p["b_fc"]
    return pred, h_new, c_new


def reference_forward_bf16(sentence, h, c, p):
    """Same math with the kernel's precision policy (bf16 matmul inputs, f32 accum)."""
    bf = jnp.bfloat16
    gates = (jnp.dot(sentence.astype(bf), p["w_ih"].astype(bf).T,
                     preferred_element_type=jnp.float32)
             + jnp.dot(h.astype(bf), p["w_hh"].astype(bf).T,
                       preferred_element_type=jnp.float32)
             + p["b_ih"] + p["b_hh"])
    H = h.shape[-1]
    i = jax.nn.sigmoid(gates[:, 0 * H:1 * H])
    f = jax.nn.sigmoid(gates[:, 1 * H:2 * H])
    g = jnp.tanh(gates[:, 2 * H:3 * H])
    o = jax.nn.sigmoid(gates[:, 3 * H:4 * H])
    c_new = f * c + i * g
    h_new = o * jnp.tanh(c_new)
    pred = (jnp.dot(h_new.astype(bf), p["w_fc"].astype(bf).T,
                    preferred_element_type=jnp.float32) + p["b_fc"])
    return pred, h_new, c_new


def _check(sentence, h, c, params, packed):
    pred, h1, c1 = sentence_decoder_forward(sentence, h, c, packed)
    jax.block_until_ready((pred, h1, c1))

    # Tight check against a reference with the kernel's exact precision policy.
    pred_q, h_q, c_q = reference_forward_bf16(sentence, h, c, params)
    assert jnp.allclose(pred, pred_q, atol=1e-4, rtol=1e-4)
    assert jnp.allclose(h1, h_q, atol=1e-4, rtol=1e-4)
    assert jnp.allclose(c1, c_q, atol=1e-4, rtol=1e-4)

    # Fidelity check against the pure-f32 PyTorch-semantics reference
    # (looser tolerance: weights are bf16-quantized in the kernel).
    pred_r, h_r, c_r = reference_forward_f32(sentence, h, c, params)
    assert jnp.allclose(pred, pred_r, atol=5e-2, rtol=5e-2)
    assert jnp.allclose(h1, h_r, atol=5e-2, rtol=5e-2)
    assert jnp.allclose(c1, c_r, atol=5e-2, rtol=5e-2)
    return pred, h1, c1


# ----------------------------------------------------------------------------- main
if __name__ == "__main__":
    # Small shapes consistent with the module: hidden_dim = feature_dim * 2.
    batch = 8
    feature_dim = 128
    hidden_dim = feature_dim * 2        # 256 (multiple of 128 -> lane-aligned gates)
    embed_dim = 32

    key = jax.random.PRNGKey(0)
    k_x, k_p1, k_p2 = jax.random.split(key, 3)
    sentence = jax.random.normal(k_x, (batch, embed_dim), jnp.float32)
    h0 = jnp.zeros((batch, hidden_dim), jnp.float32)   # init_hc
    c0 = jnp.zeros((batch, hidden_dim), jnp.float32)

    # Case 1: small vocab -> single-tile fast path (Vp=512, grid=(1,)).
    params_small = init_params(k_p1, embed_dim, hidden_dim, 500)
    packed_small = pack_params(params_small)            # one-time weight packing
    _check(sentence, h0, c0, params_small, packed_small)

    # Case 2: larger vocab -> streamed/pipelined vocab tiles (grid=(4,), TN=1024),
    # exercising the pl.when cell + bf16 h' scratch carry across tiles.
    params_big = init_params(k_p2, embed_dim, hidden_dim, 4000)
    packed_big = pack_params(params_big, max_vocab_tile=1024)
    _check(sentence, h0, c0, params_big, packed_big)

    print("KERNEL_OK")
</pallas_src>

<mosaic_0001>
module attributes {stable_mosaic.version = 11 : i64} {
  func.func @sentence_decoder_kernel(%arg0: i32, %arg1: memref<8x32xf32, #tpu.memory_space<vmem>>, %arg2: memref<8x256xf32, #tpu.memory_space<vmem>>, %arg3: memref<8x256xf32, #tpu.memory_space<vmem>>, %arg4: memref<32x1024xbf16, #tpu.memory_space<vmem>>, %arg5: memref<256x1024xbf16, #tpu.memory_space<vmem>>, %arg6: memref<1x1024xf32, #tpu.memory_space<vmem>>, %arg7: memref<256x512xbf16, #tpu.memory_space<vmem>>, %arg8: memref<1x512xf32, #tpu.memory_space<vmem>>, %arg9: memref<8x512xf32, #tpu.memory_space<vmem>>, %arg10: memref<8x256xf32, #tpu.memory_space<vmem>>, %arg11: memref<8x256xf32, #tpu.memory_space<vmem>>, %arg12: memref<8x256xbf16, #tpu.memory_space<vmem>>) attributes {dimension_semantics = [#tpu.dimension_semantics<arbitrary>], iteration_bounds = array<i64: 1>, scalar_prefetch = 0 : i64, scratch_operands = 1 : i64, tpu.core_type = #tpu.core_type<tc>, window_params = [{pipeline_mode = #tpu.pipeline_mode<synchronous>, transform_indices = @transform_0, window_bounds = array<i64: 8, 32>}, {pipeline_mode = #tpu.pipeline_mode<synchronous>, transform_indices = @transform_1, window_bounds = array<i64: 8, 256>}, {pipeline_mode = #tpu.pipeline_mode<synchronous>, transform_indices = @transform_2, window_bounds = array<i64: 8, 256>}, {pipeline_mode = #tpu.pipeline_mode<synchronous>, transform_indices = @transform_3, window_bounds = array<i64: 32, 1024>}, {pipeline_mode = #tpu.pipeline_mode<synchronous>, transform_indices = @transform_4, window_bounds = array<i64: 256, 1024>}, {pipeline_mode = #tpu.pipeline_mode<synchronous>, transform_indices = @transform_5, window_bounds = array<i64: 1, 1024>}, {transform_indices = @transform_6, window_bounds = array<i64: 256, 512>}, {transform_indices = @transform_7, window_bounds = array<i64: 1, 512>}, {transform_indices = @transform_8, window_bounds = array<i64: 8, 512>}, {pipeline_mode = #tpu.pipeline_mode<synchronous>, transform_indices = @transform_9, window_bounds = array<i64: 8, 256>}, {pipeline_mode = #tpu.pipeline_mode<synchronous>, transform_indices = @transform_10, window_bounds = array<i64: 8, 256>}]} {
    %c0_i32 = arith.constant 0 : i32
    %0 = arith.cmpi eq, %arg0, %c0_i32 : i32
    %1 = arith.extui %0 : i1 to i32
    %c0_i32_0 = arith.constant 0 : i32
    %2 = arith.cmpi ne, %1, %c0_i32_0 : i32
    scf.if %2 {
      %c0_8 = arith.constant 0 : index
      %c0_9 = arith.constant 0 : index
      %10 = vector.load %arg1[%c0_8, %c0_9] : memref<8x32xf32, #tpu.memory_space<vmem>>, vector<8x32xf32>
      %11 = arith.truncf %10 : vector<8x32xf32> to vector<8x32xbf16>
      %c0_10 = arith.constant 0 : index
      %c0_11 = arith.constant 0 : index
      %12 = vector.load %arg4[%c0_10, %c0_11] : memref<32x1024xbf16, #tpu.memory_space<vmem>>, vector<32x1024xbf16>
      %cst_12 = arith.constant dense<0.000000e+00> : vector<8x1024xf32>
      %13 = tpu.matmul %11, %12, %cst_12 {dimension_numbers = #tpu.dot_dimension_numbers<[1], [0], [0], [1], [0, 0, 1, 1], [], []>} : vector<8x32xbf16>, vector<32x1024xbf16>, vector<8x1024xf32> -> vector<8x1024xf32>
      %c0_13 = arith.constant 0 : index
      %c0_14 = arith.constant 0 : index
      %14 = vector.load %arg2[%c0_13, %c0_14] : memref<8x256xf32, #tpu.memory_space<vmem>>, vector<8x256xf32>
      %15 = arith.truncf %14 : vector<8x256xf32> to vector<8x256xbf16>
      %c0_15 = arith.constant 0 : index
      %c0_16 = arith.constant 0 : index
      %16 = vector.load %arg5[%c0_15, %c0_16] : memref<256x1024xbf16, #tpu.memory_space<vmem>>, vector<256x1024xbf16>
      %cst_17 = arith.constant dense<0.000000e+00> : vector<8x1024xf32>
      %17 = tpu.matmul %15, %16, %cst_17 {dimension_numbers = #tpu.dot_dimension_numbers<[1], [0], [0], [1], [0, 0, 1, 1], [], []>} : vector<8x256xbf16>, vector<256x1024xbf16>, vector<8x1024xf32> -> vector<8x1024xf32>
      %18 = arith.addf %13, %17 : vector<8x1024xf32>
      %c0_18 = arith.constant 0 : index
      %c0_19 = arith.constant 0 : index
      %19 = vector.load %arg6[%c0_18, %c0_19] : memref<1x1024xf32, #tpu.memory_space<vmem>>, vector<1x1024xf32>
      %20 = vector.broadcast %19 : vector<1x1024xf32> to vector<8x1024xf32>
      %21 = arith.addf %18, %20 : vector<8x1024xf32>
      %22 = vector.extract_strided_slice %21 {offsets = [0, 0], sizes = [8, 256], strides = [1, 1]} : vector<8x1024xf32> to vector<8x256xf32>
      %23 = arith.negf %22 : vector<8x256xf32>
      %24 = math.exp %23 : vector<8x256xf32>
      %cst_20 = arith.constant 1.000000e+00 : f32
      %25 = vector.broadcast %cst_20 : f32 to vector<8x256xf32>
      %26 = arith.addf %25, %24 : vector<8x256xf32>
      %27 = arith.divf %25, %26 : vector<8x256xf32>
      %28 = vector.extract_strided_slice %21 {offsets = [0, 256], sizes = [8, 256], strides = [1, 1]} : vector<8x1024xf32> to vector<8x256xf32>
      %29 = arith.negf %28 : vector<8x256xf32>
      %30 = math.exp %29 : vector<8x256xf32>
      %cst_21 = arith.constant 1.000000e+00 : f32
      %31 = vector.broadcast %cst_21 : f32 to vector<8x256xf32>
      %32 = arith.addf %31, %30 : vector<8x256xf32>
      %33 = arith.divf %31, %32 : vector<8x256xf32>
      %34 = vector.extract_strided_slice %21 {offsets = [0, 512], sizes = [8, 256], strides = [1, 1]} : vector<8x1024xf32> to vector<8x256xf32>
      %35 = math.tanh %34 : vector<8x256xf32>
      %36 = vector.extract_strided_slice %21 {offsets = [0, 768], sizes = [8, 256], strides = [1, 1]} : vector<8x1024xf32> to vector<8x256xf32>
      %37 = arith.negf %36 : vector<8x256xf32>
      %38 = math.exp %37 : vector<8x256xf32>
      %cst_22 = arith.constant 1.000000e+00 : f32
      %39 = vector.broadcast %cst_22 : f32 to vector<8x256xf32>
      %40 = arith.addf %39, %38 : vector<8x256xf32>
      %41 = arith.divf %39, %40 : vector<8x256xf32>
      %c0_23 = arith.constant 0 : index
      %c0_24 = arith.constant 0 : index
      %42 = vector.load %arg3[%c0_23, %c0_24] : memref<8x256xf32, #tpu.memory_space<vmem>>, vector<8x256xf32>
      %43 = arith.mulf %33, %42 : vector<8x256xf32>
      %44 = arith.mulf %27, %35 : vector<8x256xf32>
      %45 = arith.addf %43, %44 : vector<8x256xf32>
      %46 = math.tanh %45 : vector<8x256xf32>
      %47 = arith.mulf %41, %46 : vector<8x256xf32>
      %c0_25 = arith.constant 0 : index
      %c0_26 = arith.constant 0 : index
      %48 = vector.load %arg11[%c0_25, %c0_26] : memref<8x256xf32, #tpu.memory_space<vmem>>, vector<8x256xf32>
      tpu.vector_store %arg11[%c0_25, %c0_26], %45 {strides = array<i32>} : memref<8x256xf32, #tpu.memory_space<vmem>>, vector<8x256xf32>,
      %c0_27 = arith.constant 0 : index
      %c0_28 = arith.constant 0 : index
      %49 = vector.load %arg10[%c0_27, %c0_28] : memref<8x256xf32, #tpu.memory_space<vmem>>, vector<8x256xf32>
      tpu.vector_store %arg10[%c0_27, %c0_28], %47 {strides = array<i32>} : memref<8x256xf32, #tpu.memory_space<vmem>>, vector<8x256xf32>,
      %50 = arith.truncf %47 : vector<8x256xf32> to vector<8x256xbf16>
      %c0_29 = arith.constant 0 : index
      %c0_30 = arith.constant 0 : index
      %51 = vector.load %arg12[%c0_29, %c0_30] : memref<8x256xbf16, #tpu.memory_space<vmem>>, vector<8x256xbf16>
      tpu.vector_store %arg12[%c0_29, %c0_30], %50 {strides = array<i32>} : memref<8x256xbf16, #tpu.memory_space<vmem>>, vector<8x256xbf16>,
    } else {
    }
    %c0 = arith.constant 0 : index
    %c0_1 = arith.constant 0 : index
    %3 = vector.load %arg12[%c0, %c0_1] : memref<8x256xbf16, #tpu.memory_space<vmem>>, vector<8x256xbf16>
    %c0_2 = arith.constant 0 : index
    %c0_3 = arith.constant 0 : index
    %4 = vector.load %arg7[%c0_2, %c0_3] : memref<256x512xbf16, #tpu.memory_space<vmem>>, vector<256x512xbf16>
    %cst = arith.constant dense<0.000000e+00> : vector<8x512xf32>
    %5 = tpu.matmul %3, %4, %cst {dimension_numbers = #tpu.dot_dimension_numbers<[1], [0], [0], [1], [0, 0, 1, 1], [], []>} : vector<8x256xbf16>, vector<256x512xbf16>, vector<8x512xf32> -> vector<8x512xf32>
    %c0_4 = arith.constant 0 : index
    %c0_5 = arith.constant 0 : index
    %6 = vector.load %arg8[%c0_4, %c0_5] : memref<1x512xf32, #tpu.memory_space<vmem>>, vector<1x512xf32>
    %7 = vector.broadcast %6 : vector<1x512xf32> to vector<8x512xf32>
    %8 = arith.addf %5, %7 : vector<8x512xf32>
    %c0_6 = arith.constant 0 : index
    %c0_7 = arith.constant 0 : index
    %9 = vector.load %arg9[%c0_6, %c0_7] : memref<8x512xf32, #tpu.memory_space<vmem>>, vector<8x512xf32>
    tpu.vector_store %arg9[%c0_6, %c0_7], %8 {strides = array<i32>} : memref<8x512xf32, #tpu.memory_space<vmem>>, vector<8x512xf32>,
    return
  }
  func.func @transform_0(%arg0: i32) -> (i32, i32) {
    %c0_i32 = arith.constant 0 : i32
    %c0_i32_0 = arith.constant 0 : i32
    %c0_i32_1 = arith.constant 0 : i32
    return %c0_i32, %c0_i32_0 : i32, i32
  }
  func.func @transform_1(%arg0: i32) -> (i32, i32) {
    %c0_i32 = arith.constant 0 : i32
    %c0_i32_0 = arith.constant 0 : i32
    %c0_i32_1 = arith.constant 0 : i32
    return %c0_i32, %c0_i32_0 : i32, i32
  }
  func.func @transform_2(%arg0: i32) -> (i32, i32) {
    %c0_i32 = arith.constant 0 : i32
    %c0_i32_0 = arith.constant 0 : i32
    %c0_i32_1 = arith.constant 0 : i32
    return %c0_i32, %c0_i32_0 : i32, i32
  }
  func.func @transform_3(%arg0: i32) -> (i32, i32) {
    %c0_i32 = arith.constant 0 : i32
    %c0_i32_0 = arith.constant 0 : i32
    %c0_i32_1 = arith.constant 0 : i32
    return %c0_i32, %c0_i32_0 : i32, i32
  }
  func.func @transform_4(%arg0: i32) -> (i32, i32) {
    %c0_i32 = arith.constant 0 : i32
    %c0_i32_0 = arith.constant 0 : i32
    %c0_i32_1 = arith.constant 0 : i32
    return %c0_i32, %c0_i32_0 : i32, i32
  }
  func.func @transform_5(%arg0: i32) -> (i32, i32) {
    %c0_i32 = arith.constant 0 : i32
    %c0_i32_0 = arith.constant 0 : i32
    %c0_i32_1 = arith.constant 0 : i32
    return %c0_i32, %c0_i32_0 : i32, i32
  }
  func.func @transform_6(%arg0: i32) -> (i32, i32) {
    %c0_i32 = arith.constant 0 : i32
    %c0_i32_0 = arith.constant 0 : i32
    return %c0_i32, %arg0 : i32, i32
  }
  func.func @transform_7(%arg0: i32) -> (i32, i32) {
    %c0_i32 = arith.constant 0 : i32
    %c0_i32_0 = arith.constant 0 : i32
    return %c0_i32, %arg0 : i32, i32
  }
  func.func @transform_8(%arg0: i32) -> (i32, i32) {
    %c0_i32 = arith.constant 0 : i32
    %c0_i32_0 = arith.constant 0 : i32
    return %c0_i32, %arg0 : i32, i32
  }
  func.func @transform_9(%arg0: i32) -> (i32, i32) {
    %c0_i32 = arith.constant 0 : i32
    %c0_i32_0 = arith.constant 0 : i32
    %c0_i32_1 = arith.constant 0 : i32
    return %c0_i32, %c0_i32_0 : i32, i32
  }
  func.func @transform_10(%arg0: i32) -> (i32, i32) {
    %c0_i32 = arith.constant 0 : i32
    %c0_i32_0 = arith.constant 0 : i32
    %c0_i32_1 = arith.constant 0 : i32
    return %c0_i32, %c0_i32_0 : i32, i32
  }
}

</mosaic_0001>

<bundles_post_ra>
// kernel: tpu_custom_call.1
= control target key start
LH: loop header
LB: loop body
LE: loop exit
PB: predicated region body
PF: predicated region fallthrough
CT: control target
= control target key end

     0   :  { %16 = vsyncpa [#allocation4], 0  ;;  %s2683_s0 = inlined_call_operand.hbm [shape: f32[8,32], index: 0, kind: input, shape index: {}]   ;;  %s2684_s1 = inlined_call_operand.hbm [shape: f32[8,256], index: 1, kind: input, shape index: {}]   ;;  %s2685_s2 = inlined_call_operand.hbm [shape: f32[8,256], index: 2, kind: input, shape index: {}]   ;;  %s2686_s3 = inlined_call_operand.hbm [shape: bf16[32,1024], index: 3, kind: input, shape index: {}]   ;;  %s2687_s4 = inlined_call_operand.hbm [shape: bf16[256,1024], index: 4, kind: input, shape index: {}]   ;;  %s2688_s5 = inlined_call_operand.vmem [shape: f32[1,1024], index: 5, kind: input, shape index: {}]   ;;  %s2689_s6 = inlined_call_operand.hbm [shape: bf16[256,512], index: 6, kind: input, shape index: {}]   ;;  %s2690_s7 = inlined_call_operand.vmem [shape: f32[1,512], index: 7, kind: input, shape index: {}]   ;;  %s2691_s8 = inlined_call_operand.hbm [shape: f32[8,512], index: 8, kind: output, shape index: {0}]   ;;  %s2692_s9 = inlined_call_operand.hbm [shape: f32[8,256], index: 9, kind: output, shape index: {1}]   ;;  %s2693_s10 = inlined_call_operand.hbm [shape: f32[8,256], index: 10, kind: output, shape index: {2}]  }
   0x1   :  { %17 = vsyncpa [#allocation7], 0 }
   0x2   :  { %18 = vsyncpa [#allocation10], 0 }
   0x3   :  { %19 = vsyncpa [#allocation13], 0 }
   0x4   :  { %20 = vsyncpa [#allocation5], 0 }
   0x5   :  { %21 = vsyncpa [#allocation16], 0  ;;  %s2533_s13 = smov [#allocation6]   ;;  %s2534_s15 = smov [#allocation9]  }
   0x6   :  { %s38_s14 = sshll.u32 %s2533_s13, 4  ;;  %s57_s16 = sshll.u32 %s2534_s15, 4  ;;  %s39_s14 = int_to_ptr.vmem [resolvable:$true] %s38_s14  ;;  %s58_s16 = int_to_ptr.vmem [resolvable:$true] %s57_s16 }
   0x7   :  { %s2349_s17 = scalar_lea.vmem %s39_s14, 256  ;;  %p2354_p1 = scmp.lt.s32.totalorder %s39_s14, %s39_s14 }
   0x8   :  { %p2350_p0 = scmp.ne.s32.totalorder %s39_s14, %s2349_s17  ;;  %p2355_p2 = scmp.lt.s32.totalorder %s2349_s17, %s2349_s17 }
   0xa   :  { %p2356_p3 = por %p2355_p2, %p2354_p1 }
   0xc   :  { %p2357_p4 = pnand %p2356_p3, %p2350_p0 }
   0xe   :  { %2360 = shalt.err (!%p2357_p4)
}
   0xf   :  { %41 = dma.hbm_to_vmem [thread:$0]  %s2684_s1, 256, %s39_s14, [#allocation7]  }
  0x10   :  { %s2369_s20 = scalar_lea.vmem %s58_s16, 2048  ;;  %p2374_p6 = scmp.lt.s32.totalorder %s58_s16, %s58_s16 }
  0x11   :  { %p2370_p5 = scmp.ne.s32.totalorder %s58_s16, %s2369_s20  ;;  %p2375_p7 = scmp.lt.s32.totalorder %s2369_s20, %s2369_s20 }
  0x13   :  { %p2376_p8 = por %p2375_p7, %p2374_p6 }
  0x15   :  { %p2377_p9 = pnand %p2376_p8, %p2370_p5 }
  0x17   :  { %2380 = shalt.err (!%p2377_p9)
}
  0x18   :  { %s2535_s21 = smov 512   ;;  %s2536_s22 = smov 32  }
  0x19   :  { %63 = dma.hbm_to_vmem [thread:$0]  %s2686_s3, 2048, %s58_s16, [#allocation10], %s2535_s21, %s2535_s21, %s2536_s22  }
  0x1a   :  { %s2537_s25 = smov [#allocation3]   ;;  %s2538_s27 = smov [#allocation8]  }
  0x1b   :  { %s28_s26 = sshll.u32 %s2537_s25, 4  ;;  %s48_s1 = sshll.u32 %s2538_s27, 4  ;;  %s29_s26 = int_to_ptr.vmem [resolvable:$true] %s28_s26  ;;  %s49_s1 = int_to_ptr.vmem [resolvable:$true] %s48_s1 }
  0x1c   :  { %s2389_s28 = scalar_lea.vmem %s29_s26, 128  ;;  %p2394_p11 = scmp.lt.s32.totalorder %s29_s26, %s29_s26 }
  0x1d   :  { %p2390_p10 = scmp.ne.s32.totalorder %s29_s26, %s2389_s28  ;;  %p2395_p12 = scmp.lt.s32.totalorder %s2389_s28, %s2389_s28 }
  0x1f   :  { %p2396_p13 = por %p2395_p12, %p2394_p11 }
  0x21   :  { %p2397_p0 = pnand %p2396_p13, %p2390_p10 }
  0x23   :  { %2400 = shalt.err (!%p2397_p0)
}
  0x24   :  { %31 = dma.hbm_to_vmem [thread:$0]  %s2683_s0, 128, %s29_s26, [#allocation4]  }
  0x25   :  { %s2409_s11 = scalar_lea.vmem %s49_s1, 256  ;;  %p2414_p2 = scmp.lt.s32.totalorder %s49_s1, %s49_s1 }
  0x26   :  { %p2410_p1 = scmp.ne.s32.totalorder %s49_s1, %s2409_s11  ;;  %p2415_p3 = scmp.lt.s32.totalorder %s2409_s11, %s2409_s11 }
  0x28   :  { %p2416_p4 = por %p2415_p3, %p2414_p2 }
  0x2a   :  { %p2417_p5 = pnand %p2416_p4, %p2410_p1 }
  0x2c   :  { %2420 = shalt.err (!%p2417_p5)
}
  0x2d   :  { %51 = dma.hbm_to_vmem [thread:$0]  %s2685_s2, 256, %s49_s1, [#allocation7]  }
  0x2e   :  { %s2539_s13 = smov [#allocation11]   ;;  %s2540_s15 = smov [#allocation12]  }
  0x2f   :  { %s69_s14 = sshll.u32 %s2539_s13, 4  ;;  %s83_s16 = sshll.u32 %s2540_s15, 4  ;;  %s70_s14 = int_to_ptr.vmem [resolvable:$true] %s69_s14  ;;  %s84_s16 = int_to_ptr.vmem [resolvable:$true] %s83_s16 }
  0x30   :  { %s2429_s17 = scalar_lea.vmem %s70_s14, 16384  ;;  %p2434_p7 = scmp.lt.s32.totalorder %s70_s14, %s70_s14 }
  0x31   :  { %p2430_p6 = scmp.ne.s32.totalorder %s70_s14, %s2429_s17  ;;  %p2435_p8 = scmp.lt.s32.totalorder %s2429_s17, %s2429_s17 }
  0x33   :  { %p2436_p9 = por %p2435_p8, %p2434_p7 }
  0x35   :  { %p2437_p10 = pnand %p2436_p9, %p2430_p6 }
  0x37   :  { %2440 = shalt.err (!%p2437_p10)
}
  0x38   :  { %75 = dma.hbm_to_vmem [thread:$0]  %s2687_s4, 16384, %s70_s14, [#allocation10], %s2535_s21, %s2535_s21, %s2536_s22  }
  0x39   :  { %s2449_s2 = scalar_lea.vmem %s84_s16, 8192  ;;  %p2454_p12 = scmp.lt.s32.totalorder %s84_s16, %s84_s16 }
  0x3a   :  { %p2450_p11 = scmp.ne.s32.totalorder %s84_s16, %s2449_s2  ;;  %p2455_p13 = scmp.lt.s32.totalorder %s2449_s2, %s2449_s2 }
  0x3c   :  { %p2456_p0 = por %p2455_p13, %p2454_p12 }
  0x3e   :  { %p2457_p1 = pnand %p2456_p0, %p2450_p11 }
  0x40   :  { %2460 = shalt.err (!%p2457_p1)
}
  0x41   :  { %s2541_s19 = smov 256   ;;  %s2542_s20 = smov 16  }
  0x42   :  { %89 = dma.hbm_to_vmem [thread:$0]  %s2689_s6, 8192, %s84_s16, [#allocation13], %s2541_s19, %s2541_s19, %s2542_s20  }
  0x43   :  { %2521 = dma.done.wait [#allocation4], 128  }
  0x44   :  { %2522 = vsyncadd [#allocation4], 4294967168 }
  0x45   :  { %2523 = dma.done.wait [#allocation7], 512  }
  0x46   :  { %2524 = vsyncadd [#allocation7], 4294966784 }
  0x47   :  { %2525 = dma.done.wait [#allocation10], 18432  }
  0x48   :  { %2526 = vsyncadd [#allocation10], 4294948864 }
  0x49   :  { %2527 = dma.done.wait [#allocation13], 8192  }
  0x4a   :  { %2528 = vsyncadd [#allocation13], 4294959104  ;;  %v193_v0 = vld [vmem:[#allocation11 + $0x1c0] sm:$0xff]  ;;  %v194_v2 = vld [vmem:[#allocation11 + $0x1c8] sm:$0xff]  ;;  %vm1149_vm0 = vcmask 261120  }
  0x4b   :  { %v197_v1 = vld [vmem:[#allocation11 + $0x1e0] sm:$0xff]  ;;  %v198_v4 = vld [vmem:[#allocation11 + $0x1e8] sm:$0xff] }
  0x4c   :  { %v2032_v3 = vcombine.high %v193_v0, %v197_v1  ;;  %v2031_v5 = vcombine.low %v193_v0, %v197_v1  ;;  %v185_v6 = vld [vmem:[#allocation11 + $0x180] sm:$0xff]  ;;  %v2034_v8 = vcombine.high %v194_v2, %v198_v4  ;;  %v2033_v9 = vcombine.low %v194_v2, %v198_v4  ;;  %v186_v11 = vld [vmem:[#allocation11 + $0x188] sm:$0xff] }
  0x4d   :  { %v189_v7 = vld [vmem:[#allocation11 + $0x1a0] sm:$0xff]  ;;  %v190_v12 = vld [vmem:[#allocation11 + $0x1a8] sm:$0xff] }
  0x4e   :  { %v2024_v10 = vcombine.high %v185_v6, %v189_v7  ;;  %v177_v13 = vld [vmem:[#allocation11 + $0x140] sm:$0xff]  ;;  %905 = vmatprep.subr.bf16.mxu0 %v2032_v3  ;;  %v2026_v14 = vcombine.high %v186_v11, %v190_v12  ;;  %v178_v16 = vld [vmem:[#allocation11 + $0x148] sm:$0xff]  ;;  %946 = vmatprep.subr.bf16.mxu1 %v2034_v8  ;;  %v2023_v18 = vcombine.low %v185_v6, %v189_v7 }
  0x4f   :  { %v181_v15 = vld [vmem:[#allocation11 + $0x160] sm:$0xff]  ;;  %v182_v17 = vld [vmem:[#allocation11 + $0x168] sm:$0xff]  ;;  %906 = vmatpush1.bf16.msra.mxu0 %v2031_v5  ;;  %947 = vmatpush1.bf16.msra.mxu1 %v2033_v9  ;;  %v2025_v19 = vcombine.low %v186_v11, %v190_v12 }
  0x50   :  { %907 = vmatprep.subr.bf16.mxu0 %v2024_v10  ;;  %v2016_v20 = vcombine.high %v177_v13, %v181_v15  ;;  %948 = vmatprep.subr.bf16.mxu1 %v2026_v14  ;;  %v2018_v21 = vcombine.high %v178_v16, %v182_v17  ;;  %v169_v22 = vld [vmem:[#allocation11 + $0x100] sm:$0xff]  ;;  %v170_v24 = vld [vmem:[#allocation11 + $0x108] sm:$0xff]  ;;  %v2015_v26 = vcombine.low %v177_v13, %v181_v15 }
  0x51   :  { %v173_v23 = vld [vmem:[#allocation11 + $0x120] sm:$0xff]  ;;  %v174_v25 = vld [vmem:[#allocation11 + $0x128] sm:$0xff]  ;;  %v2017_v27 = vcombine.low %v178_v16, %v182_v17 }
  0x52   :  { %v2008_v28 = vcombine.high %v169_v22, %v173_v23  ;;  %v2010_v29 = vcombine.high %v170_v24, %v174_v25  ;;  %v161_v30 = vld [vmem:[#allocation11 + $0xc0] sm:$0xff]  ;;  %v162_v32 = vld [vmem:[#allocation11 + $0xc8] sm:$0xff]  ;;  %v2007_v34 = vcombine.low %v169_v22, %v173_v23  ;;  %v2009_v35 = vcombine.low %v170_v24, %v174_v25 }
  0x53   :  { %908 = vmatpush1.bf16.msra.mxu0 %v2023_v18  ;;  %949 = vmatpush1.bf16.msra.mxu1 %v2025_v19  ;;  %v165_v31 = vld [vmem:[#allocation11 + $0xe0] sm:$0xff]  ;;  %v166_v33 = vld [vmem:[#allocation11 + $0xe8] sm:$0xff] }
  0x54   :  { %909 = vmatprep.subr.bf16.mxu0 %v2016_v20  ;;  %950 = vmatprep.subr.bf16.mxu1 %v2018_v21  ;;  %v2000_v36 = vcombine.high %v161_v30, %v165_v31  ;;  %v2002_v37 = vcombine.high %v162_v32, %v166_v33  ;;  %v153_v38 = vld [vmem:[#allocation11 + $0x80] sm:$0xff]  ;;  %v154_v40 = vld [vmem:[#allocation11 + $0x88] sm:$0xff]  ;;  %v1999_v42 = vcombine.low %v161_v30, %v165_v31 }
  0x55   :  { %v157_v39 = vld [vmem:[#allocation11 + $0xa0] sm:$0xff]  ;;  %v158_v41 = vld [vmem:[#allocation11 + $0xa8] sm:$0xff]  ;;  %v2001_v43 = vcombine.low %v162_v32, %v166_v33 }
  0x56   :  { %v1992_v44 = vcombine.high %v153_v38, %v157_v39  ;;  %v1994_v45 = vcombine.high %v154_v40, %v158_v41  ;;  %v145_v46 = vld [vmem:[#allocation11 + $0x40] sm:$0xff]  ;;  %v146_v48 = vld [vmem:[#allocation11 + $0x48] sm:$0xff]  ;;  %v1991_v50 = vcombine.low %v153_v38, %v157_v39  ;;  %v1993_v51 = vcombine.low %v154_v40, %v158_v41 }
  0x57   :  { %910 = vmatpush1.bf16.msra.mxu0 %v2015_v26  ;;  %951 = vmatpush1.bf16.msra.mxu1 %v2017_v27  ;;  %v149_v47 = vld [vmem:[#allocation11 + $0x60] sm:$0xff]  ;;  %v150_v49 = vld [vmem:[#allocation11 + $0x68] sm:$0xff] }
  0x58   :  { %911 = vmatprep.subr.bf16.mxu0 %v2008_v28  ;;  %952 = vmatprep.subr.bf16.mxu1 %v2010_v29  ;;  %v1984_v52 = vcombine.high %v145_v46, %v149_v47  ;;  %v134_v53 = vld [vmem:[#allocation6 + $0x8] sm:$0xff]  ;;  %v1986_v54 = vcombine.high %v146_v48, %v150_v49  ;;  %v137_v55 = vld [vmem:[#allocation11] sm:$0xff]  ;;  %v1983_v60 = vcombine.low %v145_v46, %v149_v47 }
  0x59   :  { %v141_v56 = vld [vmem:[#allocation11 + $0x20] sm:$0xff]  ;;  %v2626_v57 = vpack.c.bf16 %v134_v53, %v134_v53  ;;  %v138_v58 = vld [vmem:[#allocation11 + $0x8] sm:$0xff]  ;;  %v1985_v61 = vcombine.low %v146_v48, %v150_v49 }
  0x5a   :  { %v142_v59 = vld [vmem:[#allocation11 + $0x28] sm:$0xff]  ;;  %v1976_v62 = vcombine.high %v137_v55, %v141_v56  ;;  %v257_v0 = vld [vmem:[#allocation11 + $0x3c0] sm:$0xff]  ;;  %v1975_v4 = vcombine.low %v137_v55, %v141_v56 }
  0x5b   :  { %912 = vmatpush1.bf16.msra.mxu0 %v2007_v34  ;;  %953 = vmatpush1.bf16.msra.mxu1 %v2009_v35  ;;  %v1978_v63 = vcombine.high %v138_v58, %v142_v59  ;;  %v261_v1 = vld [vmem:[#allocation11 + $0x3e0] sm:$0xff]  ;;  %v258_v2 = vld [vmem:[#allocation11 + $0x3c8] sm:$0xff]  ;;  %v1977_v5 = vcombine.low %v138_v58, %v142_v59 }
  0x5c   :  { %913 = vmatprep.subr.bf16.mxu0 %v2000_v36  ;;  %954 = vmatprep.subr.bf16.mxu1 %v2002_v37  ;;  %v262_v3 = vld [vmem:[#allocation11 + $0x3e8] sm:$0xff]  ;;  %v2096_v6 = vcombine.high %v257_v0, %v261_v1  ;;  %v249_v8 = vld [vmem:[#allocation11 + $0x380] sm:$0xff]  ;;  %v2095_v12 = vcombine.low %v257_v0, %v261_v1 }
  0x5d   :  { %937 = vmatprep.mubr.bf16.mxu0 %v2626_v57  ;;  %978 = vmatprep.mubr.bf16.mxu1 %v2626_v57  ;;  %v2098_v7 = vcombine.high %v258_v2, %v262_v3  ;;  %v253_v9 = vld [vmem:[#allocation11 + $0x3a0] sm:$0xff]  ;;  %v250_v10 = vld [vmem:[#allocation11 + $0x388] sm:$0xff]  ;;  %v2097_v13 = vcombine.low %v258_v2, %v262_v3  ;;  %v196_v2 = vld [vmem:[#allocation11 + $0x1d8] sm:$0xff] }
  0x5e   :  { %v254_v11 = vld [vmem:[#allocation11 + $0x3a8] sm:$0xff]  ;;  %v2088_v14 = vcombine.high %v249_v8, %v253_v9  ;;  %v241_v16 = vld [vmem:[#allocation11 + $0x340] sm:$0xff]  ;;  %v2087_v20 = vcombine.low %v249_v8, %v253_v9  ;;  %v200_v3 = vld [vmem:[#allocation11 + $0x1f8] sm:$0xff] }
  0x5f   :  { %914 = vmatpush1.bf16.msra.mxu0 %v1999_v42  ;;  %955 = vmatpush1.bf16.msra.mxu1 %v2001_v43  ;;  %v2090_v15 = vcombine.high %v250_v10, %v254_v11  ;;  %v245_v17 = vld [vmem:[#allocation11 + $0x360] sm:$0xff]  ;;  %v242_v18 = vld [vmem:[#allocation11 + $0x348] sm:$0xff]  ;;  %v2089_v21 = vcombine.low %v250_v10, %v254_v11  ;;  %v191_v8 = vld [vmem:[#allocation11 + $0x1b0] sm:$0xff] }
  0x60   :  { %915 = vmatprep.subr.bf16.mxu0 %v1992_v44  ;;  %956 = vmatprep.subr.bf16.mxu1 %v1994_v45  ;;  %v246_v19 = vld [vmem:[#allocation11 + $0x368] sm:$0xff]  ;;  %v2080_v22 = vcombine.high %v241_v16, %v245_v17  ;;  %v233_v24 = vld [vmem:[#allocation11 + $0x300] sm:$0xff]  ;;  %v2079_v28 = vcombine.low %v241_v16, %v245_v17  ;;  %v188_v11 = vld [vmem:[#allocation11 + $0x198] sm:$0xff] }
  0x61   :  { %v2082_v23 = vcombine.high %v242_v18, %v246_v19  ;;  %v237_v25 = vld [vmem:[#allocation11 + $0x320] sm:$0xff]  ;;  %v234_v26 = vld [vmem:[#allocation11 + $0x308] sm:$0xff]  ;;  %v2081_v29 = vcombine.low %v242_v18, %v246_v19  ;;  %v179_v16 = vld [vmem:[#allocation11 + $0x150] sm:$0xff]  ;;  %v2037_v18 = vcombine.low %v196_v2, %v200_v3 }
  0x62   :  { %v238_v27 = vld [vmem:[#allocation11 + $0x328] sm:$0xff]  ;;  %v2072_v30 = vcombine.high %v233_v24, %v237_v25  ;;  %v225_v32 = vld [vmem:[#allocation11 + $0x2c0] sm:$0xff]  ;;  %v2071_v36 = vcombine.low %v233_v24, %v237_v25  ;;  %v183_v17 = vld [vmem:[#allocation11 + $0x170] sm:$0xff] }
  0x63   :  { %916 = vmatpush1.bf16.msra.mxu0 %v1991_v50  ;;  %957 = vmatpush1.bf16.msra.mxu1 %v1993_v51  ;;  %v2074_v31 = vcombine.high %v234_v26, %v238_v27  ;;  %v229_v33 = vld [vmem:[#allocation11 + $0x2e0] sm:$0xff]  ;;  %v226_v34 = vld [vmem:[#allocation11 + $0x2c8] sm:$0xff]  ;;  %v2073_v37 = vcombine.low %v234_v26, %v238_v27  ;;  %v2020_v25 = vcombine.high %v179_v16, %v183_v17  ;;  %v171_v27 = vld [vmem:[#allocation11 + $0x110] sm:$0xff] }
  0x64   :  { %917 = vmatprep.subr.bf16.mxu0 %v1984_v52  ;;  %958 = vmatprep.subr.bf16.mxu1 %v1986_v54  ;;  %v230_v35 = vld [vmem:[#allocation11 + $0x2e8] sm:$0xff]  ;;  %v2064_v38 = vcombine.high %v225_v32, %v229_v33  ;;  %v217_v40 = vld [vmem:[#allocation11 + $0x280] sm:$0xff]  ;;  %v2063_v44 = vcombine.low %v225_v32, %v229_v33 }
  0x65   :  { %v2066_v39 = vcombine.high %v226_v34, %v230_v35  ;;  %v221_v41 = vld [vmem:[#allocation11 + $0x2a0] sm:$0xff]  ;;  %v218_v42 = vld [vmem:[#allocation11 + $0x288] sm:$0xff]  ;;  %v2065_v47 = vcombine.low %v226_v34, %v230_v35  ;;  %v163_v35 = vld [vmem:[#allocation11 + $0xd0] sm:$0xff] }
  0x66   :  { %v222_v43 = vld [vmem:[#allocation11 + $0x2a8] sm:$0xff]  ;;  %v209_v45 = vld [vmem:[#allocation11 + $0x240] sm:$0xff]  ;;  %v2056_v48 = vcombine.high %v217_v40, %v221_v41  ;;  %v2055_v52 = vcombine.low %v217_v40, %v221_v41 }
  0x67   :  { %918 = vmatpush1.bf16.msra.mxu0 %v1983_v60  ;;  %959 = vmatpush1.bf16.msra.mxu1 %v1985_v61  ;;  %v213_v46 = vld [vmem:[#allocation11 + $0x260] sm:$0xff]  ;;  %v210_v49 = vld [vmem:[#allocation11 + $0x248] sm:$0xff]  ;;  %v2058_v51 = vcombine.high %v218_v42, %v222_v43  ;;  %v2057_v55 = vcombine.low %v218_v42, %v222_v43  ;;  %v155_v42 = vld [vmem:[#allocation11 + $0x90] sm:$0xff] }
  0x68   :  { %919 = vmatprep.subr.bf16.mxu0 %v1976_v62  ;;  %960 = vmatprep.subr.bf16.mxu1 %v1978_v63  ;;  %v214_v50 = vld [vmem:[#allocation11 + $0x268] sm:$0xff]  ;;  %v201_v53 = vld [vmem:[#allocation11 + $0x200] sm:$0xff]  ;;  %v2048_v56 = vcombine.high %v209_v45, %v213_v46  ;;  %v2047_v61 = vcombine.low %v209_v45, %v213_v46  ;;  %v195_v62 = vld [vmem:[#allocation11 + $0x1d0] sm:$0xff] }
  0x69   :  { %v205_v54 = vld [vmem:[#allocation11 + $0x220] sm:$0xff]  ;;  %v202_v58 = vld [vmem:[#allocation11 + $0x208] sm:$0xff]  ;;  %v2050_v60 = vcombine.high %v210_v49, %v214_v50  ;;  %v199_v63 = vld [vmem:[#allocation11 + $0x1f0] sm:$0xff]  ;;  %v2049_v0 = vcombine.low %v210_v49, %v214_v50 }
  0x6a   :  { %v206_v59 = vld [vmem:[#allocation11 + $0x228] sm:$0xff]  ;;  %v2040_v1 = vcombine.high %v201_v53, %v205_v54  ;;  %v2036_v10 = vcombine.high %v195_v62, %v199_v63  ;;  %v159_v43 = vld [vmem:[#allocation11 + $0xb0] sm:$0xff]  ;;  %v160_v45 = vld [vmem:[#allocation11 + $0xb8] sm:$0xff] }
  0x6b   :  { %920 = vmatpush1.bf16.msra.mxu0 %v1975_v4  ;;  %961 = vmatpush1.bf16.msra.mxu1 %v1977_v5  ;;  %v2042_v4 = vcombine.high %v202_v58, %v206_v59  ;;  %v133_v5 = vld [vmem:[#allocation6] sm:$0xff]  ;;  %v2041_v9 = vcombine.low %v202_v58, %v206_v59  ;;  %v147_v50 = vld [vmem:[#allocation11 + $0x50] sm:$0xff] }
  0x6c   :  { %921 = vmatprep.subr.bf16.mxu0 %v2096_v6  ;;  %962 = vmatprep.subr.bf16.mxu1 %v2098_v7  ;;  %v2039_v6 = vcombine.low %v201_v53, %v205_v54  ;;  %v187_v7 = vld [vmem:[#allocation11 + $0x190] sm:$0xff]  ;;  %v152_v53 = vld [vmem:[#allocation11 + $0x78] sm:$0xff]  ;;  %v1995_v54 = vcombine.low %v155_v42, %v159_v43 }
  0x6d   :  { %v2028_v19 = vcombine.high %v187_v7, %v191_v8  ;;  %v139_v59 = vld [vmem:[#allocation11 + $0x10] sm:$0xff] }
  0x6f   :  { %922 = vmatpush2.bf16.msra.mxu0 %v2095_v12  ;;  %963 = vmatpush2.bf16.msra.mxu1 %v2097_v13  ;;  %v192_v12 = vld [vmem:[#allocation11 + $0x1b8] sm:$0xff]  ;;  %v2038_v13 = vcombine.high %v196_v2, %v200_v3  ;;  %v259_v3 = vld [vmem:[#allocation11 + $0x3d0] sm:$0xff] }
  0x70   :  { %923 = vmatprep.subr.bf16.mxu0 %v2088_v14  ;;  %964 = vmatprep.subr.bf16.mxu1 %v2090_v15  ;;  %v2630_v14 = vpack.c.bf16 %v133_v5, %v133_v5  ;;  %v2035_v15 = vcombine.low %v195_v62, %v199_v63  ;;  %v2029_v24 = vcombine.low %v188_v11, %v192_v12  ;;  %v144_v62 = vld [vmem:[#allocation11 + $0x38] sm:$0xff] }
  0x71   :  { %v260_v5 = vld [vmem:[#allocation11 + $0x3d8] sm:$0xff] }
  0x73   :  { %924 = vmatpush2.bf16.msra.mxu0 %v2087_v20  ;;  %965 = vmatpush2.bf16.msra.mxu1 %v2089_v21  ;;  %v180_v20 = vld [vmem:[#allocation11 + $0x158] sm:$0xff] }
  0x74   :  { %925 = vmatprep.subr.bf16.mxu0 %v2080_v22  ;;  %966 = vmatprep.subr.bf16.mxu1 %v2082_v23  ;;  %v184_v21 = vld [vmem:[#allocation11 + $0x178] sm:$0xff]  ;;  %v2030_v22 = vcombine.high %v188_v11, %v192_v12  ;;  %v2027_v23 = vcombine.low %v187_v7, %v191_v8  ;;  %v251_v11 = vld [vmem:[#allocation11 + $0x390] sm:$0xff] }
  0x75   :  { %v2022_v26 = vcombine.high %v180_v20, %v184_v21  ;;  %v2021_v32 = vcombine.low %v180_v20, %v184_v21  ;;  %v255_v12 = vld [vmem:[#allocation11 + $0x3b0] sm:$0xff] }
  0x76   :  { %v243_v20 = vld [vmem:[#allocation11 + $0x350] sm:$0xff] }
  0x77   :  { %926 = vmatpush2.bf16.msra.mxu0 %v2079_v28  ;;  %967 = vmatpush2.bf16.msra.mxu1 %v2081_v29  ;;  %v175_v28 = vld [vmem:[#allocation11 + $0x130] sm:$0xff]  ;;  %v172_v29 = vld [vmem:[#allocation11 + $0x118] sm:$0xff] }
  0x78   :  { %927 = vmatprep.subr.bf16.mxu0 %v2072_v30  ;;  %968 = vmatprep.subr.bf16.mxu1 %v2074_v31  ;;  %v176_v30 = vld [vmem:[#allocation11 + $0x138] sm:$0xff]  ;;  %v2019_v31 = vcombine.low %v179_v16, %v183_v17  ;;  %v2012_v33 = vcombine.high %v171_v27, %v175_v28  ;;  %v247_v21 = vld [vmem:[#allocation11 + $0x370] sm:$0xff] }
  0x79   :  { %v2014_v34 = vcombine.high %v172_v29, %v176_v30  ;;  %v2013_v40 = vcombine.low %v172_v29, %v176_v30  ;;  %v239_v29 = vld [vmem:[#allocation11 + $0x330] sm:$0xff]  ;;  %v236_v30 = vld [vmem:[#allocation11 + $0x318] sm:$0xff] }
  0x7b   :  { %928 = vmatpush2.bf16.msra.mxu0 %v2071_v36  ;;  %969 = vmatpush2.bf16.msra.mxu1 %v2073_v37  ;;  %v167_v36 = vld [vmem:[#allocation11 + $0xf0] sm:$0xff]  ;;  %v164_v37 = vld [vmem:[#allocation11 + $0xd8] sm:$0xff] }
  0x7c   :  { %929 = vmatprep.subr.bf16.mxu0 %v2064_v38  ;;  %970 = vmatprep.subr.bf16.mxu1 %v2066_v39  ;;  %v168_v38 = vld [vmem:[#allocation11 + $0xf8] sm:$0xff]  ;;  %v2011_v39 = vcombine.low %v171_v27, %v175_v28  ;;  %v2004_v41 = vcombine.high %v163_v35, %v167_v36  ;;  %v2003_v46 = vcombine.low %v163_v35, %v167_v36  ;;  %v235_v28 = vld [vmem:[#allocation11 + $0x310] sm:$0xff] }
  0x7d   :  { %v227_v36 = vld [vmem:[#allocation11 + $0x2d0] sm:$0xff] }
  0x7f   :  { %930 = vmatpush2.bf16.msra.mxu0 %v2063_v44  ;;  %971 = vmatpush2.bf16.msra.mxu1 %v2065_v47  ;;  %v156_v44 = vld [vmem:[#allocation11 + $0x98] sm:$0xff]  ;;  %v2005_v47 = vcombine.low %v164_v37, %v168_v38 }
  0x80   :  { %931 = vmatprep.subr.bf16.mxu0 %v2056_v48  ;;  %972 = vmatprep.subr.bf16.mxu1 %v2058_v51  ;;  %v1996_v48 = vcombine.high %v155_v42, %v159_v43  ;;  %v1998_v49 = vcombine.high %v156_v44, %v160_v45  ;;  %v151_v51 = vld [vmem:[#allocation11 + $0x70] sm:$0xff] }
  0x81   :  { %v1987_v63 = vcombine.low %v147_v50, %v151_v51  ;;  %v219_v43 = vld [vmem:[#allocation11 + $0x290] sm:$0xff] }
  0x83   :  { %932 = vmatpush2.bf16.msra.mxu0 %v2055_v52  ;;  %973 = vmatpush2.bf16.msra.mxu1 %v2057_v55  ;;  %v148_v52 = vld [vmem:[#allocation11 + $0x58] sm:$0xff]  ;;  %v1997_v55 = vcombine.low %v156_v44, %v160_v45  ;;  %v223_v44 = vld [vmem:[#allocation11 + $0x2b0] sm:$0xff] }
  0x84   :  { %933 = vmatprep.subr.bf16.mxu0 %v2048_v56  ;;  %974 = vmatprep.subr.bf16.mxu1 %v2050_v60  ;;  %v1988_v56 = vcombine.high %v147_v50, %v151_v51  ;;  %v1990_v58 = vcombine.high %v148_v52, %v152_v53  ;;  %v143_v60 = vld [vmem:[#allocation11 + $0x30] sm:$0xff]  ;;  %v220_v45 = vld [vmem:[#allocation11 + $0x298] sm:$0xff] }
  0x85   :  { %v1979_v7 = vcombine.low %v139_v59, %v143_v60  ;;  %v211_v51 = vld [vmem:[#allocation11 + $0x250] sm:$0xff] }
  0x87   :  { %934 = vmatpush2.bf16.msra.mxu0 %v2047_v61  ;;  %975 = vmatpush2.bf16.msra.mxu1 %v2049_v0  ;;  %v140_v61 = vld [vmem:[#allocation11 + $0x18] sm:$0xff]  ;;  %v1989_v0 = vcombine.low %v148_v52, %v152_v53  ;;  %v215_v52 = vld [vmem:[#allocation11 + $0x270] sm:$0xff] }
  0x88   :  { %935 = vmatprep.subr.bf16.mxu0 %v2040_v1  ;;  %976 = vmatprep.subr.bf16.mxu1 %v2042_v4  ;;  %v1980_v1 = vcombine.high %v139_v59, %v143_v60  ;;  %v1982_v2 = vcombine.high %v140_v61, %v144_v62  ;;  %v263_v4 = vld [vmem:[#allocation11 + $0x3f0] sm:$0xff]  ;;  %v1981_v8 = vcombine.low %v140_v61, %v144_v62  ;;  %v212_v53 = vld [vmem:[#allocation11 + $0x258] sm:$0xff] }
  0x89   :  { %v2099_v16 = vcombine.low %v259_v3, %v263_v4  ;;  %v203_v60 = vld [vmem:[#allocation11 + $0x210] sm:$0xff]  ;;  %v204_v62 = vld [vmem:[#allocation11 + $0x218] sm:$0xff] }
  0x8a   :  { %v207_v61 = vld [vmem:[#allocation11 + $0x230] sm:$0xff] }
  0x8b   :  { %936 = vmatpush2.bf16.msra.mxu0 %v2039_v6  ;;  %977 = vmatpush2.bf16.msra.mxu1 %v2041_v9  ;;  %v264_v6 = vld [vmem:[#allocation11 + $0x3f8] sm:$0xff]  ;;  %v2100_v9 = vcombine.high %v259_v3, %v263_v4  ;;  %v125_v4 = vld [vmem:[#allocation9 + $0x40] sm:$0xff] }
  0x8c   :  { %987 = vmatprep.subr.bf16.mxu0 %v2036_v10  ;;  %1028 = vmatprep.subr.bf16.mxu1 %v2038_v13  ;;  %v2102_v10 = vcombine.high %v260_v5, %v264_v6  ;;  %v252_v13 = vld [vmem:[#allocation11 + $0x398] sm:$0xff]  ;;  %v2101_v17 = vcombine.low %v260_v5, %v264_v6  ;;  %v129_v5 = vld [vmem:[#allocation9 + $0x60] sm:$0xff]  ;;  %v126_v6 = vld [vmem:[#allocation9 + $0x48] sm:$0xff] }
  0x8e   :  { %938 = vmatmul.mubr.bf16.vlgmr.msra.gmra.mxu0 %v2630_v14  ;;  %979 = vmatmul.mubr.bf16.vlgmr.msra.gmra.mxu1 %v2630_v14 }
  0x8f   :  { %988 = vmatpush1.bf16.msra.mxu0 %v2035_v15  ;;  %1029 = vmatpush1.bf16.msra.mxu1 %v2037_v18  ;;  %v256_v15 = vld [vmem:[#allocation11 + $0x3b8] sm:$0xff]  ;;  %v2092_v18 = vcombine.high %v251_v11, %v255_v12 }
  0x90   :  { %989 = vmatprep.subr.bf16.mxu0 %v2028_v19  ;;  %1030 = vmatprep.subr.bf16.mxu1 %v2030_v22  ;;  %v2094_v19 = vcombine.high %v252_v13, %v256_v15  ;;  %v244_v22 = vld [vmem:[#allocation11 + $0x358] sm:$0xff] }
  0x91   :  { %1019 = vmatprep.mubr.bf16.mxu0 %v2626_v57  ;;  %1060 = vmatprep.mubr.bf16.mxu1 %v2626_v57  ;;  %v2006_v57 = vcombine.high %v164_v37, %v168_v38  ;;  %v231_v37 = vld [vmem:[#allocation11 + $0x2f0] sm:$0xff]  ;;  %v228_v38 = vld [vmem:[#allocation11 + $0x2d8] sm:$0xff] }
  0x93   :  { %990 = vmatpush1.bf16.msra.mxu0 %v2027_v23  ;;  %1031 = vmatpush1.bf16.msra.mxu1 %v2029_v24  ;;  %v248_v23 = vld [vmem:[#allocation11 + $0x378] sm:$0xff]  ;;  %v2091_v24 = vcombine.low %v251_v11, %v255_v12  ;;  %v117_v12 = vld [vmem:[#allocation9] sm:$0xff] }
  0x94   :  { %991 = vmatprep.subr.bf16.mxu0 %v2020_v25  ;;  %1032 = vmatprep.subr.bf16.mxu1 %v2022_v26  ;;  %v2093_v25 = vcombine.low %v252_v13, %v256_v15  ;;  %v2084_v26 = vcombine.high %v243_v20, %v247_v21  ;;  %v2086_v27 = vcombine.high %v244_v22, %v248_v23  ;;  %v121_v13 = vld [vmem:[#allocation9 + $0x20] sm:$0xff]  ;;  %v118_v15 = vld [vmem:[#allocation9 + $0x8] sm:$0xff] }
  0x97   :  { %992 = vmatpush1.bf16.msra.mxu0 %v2019_v31  ;;  %1033 = vmatpush1.bf16.msra.mxu1 %v2021_v32  ;;  %v240_v31 = vld [vmem:[#allocation11 + $0x338] sm:$0xff]  ;;  %v2083_v32 = vcombine.low %v243_v20, %v247_v21  ;;  %v127_v21 = vld [vmem:[#allocation9 + $0x50] sm:$0xff] }
  0x98   :  { %993 = vmatprep.subr.bf16.mxu0 %v2012_v33  ;;  %1034 = vmatprep.subr.bf16.mxu1 %v2014_v34  ;;  %v2085_v33 = vcombine.low %v244_v22, %v248_v23  ;;  %v2076_v34 = vcombine.high %v235_v28, %v239_v29  ;;  %v2078_v35 = vcombine.high %v236_v30, %v240_v31  ;;  %v131_v22 = vld [vmem:[#allocation9 + $0x70] sm:$0xff]  ;;  %v128_v23 = vld [vmem:[#allocation9 + $0x58] sm:$0xff] }
  0x9b   :  { %994 = vmatpush1.bf16.msra.mxu0 %v2011_v39  ;;  %1035 = vmatpush1.bf16.msra.mxu1 %v2013_v40  ;;  %v232_v39 = vld [vmem:[#allocation11 + $0x2f8] sm:$0xff]  ;;  %v2075_v40 = vcombine.low %v235_v28, %v239_v29  ;;  %v2116_v28 = vcombine.high %v127_v21, %v131_v22  ;;  %v2543_v29 = vmov 0  }
  0x9c   :  { %995 = vmatprep.subr.bf16.mxu0 %v2004_v41  ;;  %1036 = vmatprep.subr.bf16.mxu1 %v2006_v57  ;;  %v2077_v41 = vcombine.low %v236_v30, %v240_v31  ;;  %v2068_v57 = vcombine.high %v227_v36, %v231_v37  ;;  %v2070_v42 = vcombine.high %v228_v38, %v232_v39  ;;  %v119_v31 = vld [vmem:[#allocation9 + $0x10] sm:$0xff] }
  0x9f   :  { %996 = vmatpush1.bf16.msra.mxu0 %v2003_v46  ;;  %1037 = vmatpush1.bf16.msra.mxu1 %v2005_v47  ;;  %v224_v46 = vld [vmem:[#allocation11 + $0x2b8] sm:$0xff]  ;;  %v2067_v47 = vcombine.low %v227_v36, %v231_v37 }
  0xa0   :  { %997 = vmatprep.subr.bf16.mxu0 %v1996_v48  ;;  %1038 = vmatprep.subr.bf16.mxu1 %v1998_v49  ;;  %v2069_v48 = vcombine.low %v228_v38, %v232_v39  ;;  %v2060_v49 = vcombine.high %v219_v43, %v223_v44  ;;  %v2062_v50 = vcombine.high %v220_v45, %v224_v46 }
  0xa3   :  { %998 = vmatpush1.bf16.msra.mxu0 %v1995_v54  ;;  %1039 = vmatpush1.bf16.msra.mxu1 %v1997_v55  ;;  %v216_v54 = vld [vmem:[#allocation11 + $0x278] sm:$0xff]  ;;  %v2059_v55 = vcombine.low %v219_v43, %v223_v44  ;;  %v2221_v44 = vld [vmem:[#allocation12 + $0xc4] ss:$16 sps:$4 sm:$0xff]  }
  0xa4   :  { %999 = vmatprep.subr.bf16.mxu0 %v1988_v56  ;;  %1040 = vmatprep.subr.bf16.mxu1 %v1990_v58  ;;  %v2061_v56 = vcombine.low %v220_v45, %v224_v46  ;;  %v2052_v58 = vcombine.high %v211_v51, %v215_v52  ;;  %v2054_v59 = vcombine.high %v212_v53, %v216_v54  ;;  %v2216_v43 = vld [vmem:[#allocation12 + $0xe8] ss:$16 sps:$4 sm:$0xff]   ;;  %v2224_v45 = vld [vmem:[#allocation12 + $0xcc] ss:$16 sps:$4 sm:$0xff]   ;;  %v2219_v46 = vld [vmem:[#allocation12 + $0xc0] ss:$16 sps:$4 sm:$0xff]  }
  0xa7   :  { %1000 = vmatpush1.bf16.msra.mxu0 %v1987_v63  ;;  %1041 = vmatpush1.bf16.msra.mxu1 %v1989_v0  ;;  %v208_v63 = vld [vmem:[#allocation11 + $0x238] sm:$0xff]  ;;  %v2051_v0 = vcombine.low %v211_v51, %v215_v52  ;;  %v2233_v52 = vld [vmem:[#allocation12 + $0x84] ss:$16 sps:$4 sm:$0xff]  }
  0xa8   :  { %1001 = vmatprep.subr.bf16.mxu0 %v1980_v1  ;;  %1042 = vmatprep.subr.bf16.mxu1 %v1982_v2  ;;  %v2053_v1 = vcombine.low %v212_v53, %v216_v54  ;;  %v2044_v2 = vcombine.high %v203_v60, %v207_v61  ;;  %v2046_v3 = vcombine.high %v204_v62, %v208_v63  ;;  %v2228_v51 = vld [vmem:[#allocation12 + $0xa8] ss:$16 sps:$4 sm:$0xff]   ;;  %v2236_v53 = vld [vmem:[#allocation12 + $0x8c] ss:$16 sps:$4 sm:$0xff]   ;;  %v2231_v54 = vld [vmem:[#allocation12 + $0x80] ss:$16 sps:$4 sm:$0xff]  }
  0xab   :  { %1002 = vmatpush1.bf16.msra.mxu0 %v1979_v7  ;;  %1043 = vmatpush1.bf16.msra.mxu1 %v1981_v8  ;;  %v130_v7 = vld [vmem:[#allocation9 + $0x68] sm:$0xff]  ;;  %v2043_v8 = vcombine.low %v203_v60, %v207_v61  ;;  %v2245_v61 = vld [vmem:[#allocation12 + $0x44] ss:$16 sps:$4 sm:$0xff]  }
  0xac   :  { %1003 = vmatprep.subr.bf16.mxu0 %v2100_v9  ;;  %1044 = vmatprep.subr.bf16.mxu1 %v2102_v10  ;;  %v2045_v9 = vcombine.low %v204_v62, %v208_v63  ;;  %v2112_v10 = vcombine.high %v125_v4, %v129_v5  ;;  %v2114_v11 = vcombine.high %v126_v6, %v130_v7  ;;  %v2240_v60 = vld [vmem:[#allocation12 + $0x68] ss:$16 sps:$4 sm:$0xff]   ;;  %v2248_v62 = vld [vmem:[#allocation12 + $0x4c] ss:$16 sps:$4 sm:$0xff]   ;;  %v2243_v63 = vld [vmem:[#allocation12 + $0x40] ss:$16 sps:$4 sm:$0xff]  }
  0xaf   :  { %1004 = vmatpush2.bf16.msra.mxu0 %v2099_v16  ;;  %1045 = vmatpush2.bf16.msra.mxu1 %v2101_v17  ;;  %v122_v16 = vld [vmem:[#allocation9 + $0x28] sm:$0xff]  ;;  %v2111_v17 = vcombine.low %v125_v4, %v129_v5  ;;  %v2257_v5 = vld [vmem:[#allocation12 + $0x4] ss:$16 sps:$4 sm:$0xff]  }
  0xb0   :  { %1005 = vmatprep.subr.bf16.mxu0 %v2092_v18  ;;  %1046 = vmatprep.subr.bf16.mxu1 %v2094_v19  ;;  %v2113_v18 = vcombine.low %v126_v6, %v130_v7  ;;  %v2104_v19 = vcombine.high %v117_v12, %v121_v13  ;;  %v2106_v20 = vcombine.high %v118_v15, %v122_v16  ;;  %v2252_v4 = vld [vmem:[#allocation12 + $0x28] ss:$16 sps:$4 sm:$0xff]   ;;  %v2260_v6 = vld [vmem:[#allocation12 + $0xc] ss:$16 sps:$4 sm:$0xff]   ;;  %v2255_v7 = vld [vmem:[#allocation12] ss:$16 sps:$4 sm:$0xff]  }
  0xb3   :  { %1006 = vmatpush2.bf16.msra.mxu0 %v2091_v24  ;;  %1047 = vmatpush2.bf16.msra.mxu1 %v2093_v25  ;;  %v132_v24 = vld [vmem:[#allocation9 + $0x78] sm:$0xff]  ;;  %v2103_v25 = vcombine.low %v117_v12, %v121_v13  ;;  %v2269_v13 = vld [vmem:[#allocation12 + $0x1c4] ss:$16 sps:$4 sm:$0xff]  }
  0xb4   :  { %1007 = vmatprep.subr.bf16.mxu0 %v2084_v26  ;;  %1048 = vmatprep.subr.bf16.mxu1 %v2086_v27  ;;  %v115_v26 = vld [vmem:[#allocation3] sm:$0xff]  ;;  %v2105_v27 = vcombine.low %v118_v15, %v122_v16  ;;  %v2118_v30 = vcombine.high %v128_v23, %v132_v24  ;;  %v2117_v36 = vcombine.low %v128_v23, %v132_v24  ;;  %v2267_v16 = vld [vmem:[#allocation12 + $0x1c0] ss:$16 sps:$4 sm:$0xff]  }
  0xb5   :  { %v2264_v12 = vld [vmem:[#allocation12 + $0x1e8] ss:$16 sps:$4 sm:$0xff]   ;;  %v2272_v15 = vld [vmem:[#allocation12 + $0x1cc] ss:$16 sps:$4 sm:$0xff]   ;;  %v2279_v24 = vld [vmem:[#allocation12 + $0x180] ss:$16 sps:$4 sm:$0xff]  }
  0xb6   :  { %v2284_v23 = vld [vmem:[#allocation12 + $0x18c] ss:$16 sps:$4 sm:$0xff]  }
  0xb7   :  { %1008 = vmatpush2.bf16.msra.mxu0 %v2083_v32  ;;  %1049 = vmatpush2.bf16.msra.mxu1 %v2085_v33  ;;  %v123_v32 = vld [vmem:[#allocation9 + $0x30] sm:$0xff]  ;;  %v116_v33 = vpack.c.bf16 %v115_v26, %v115_v26 }
  0xb8   :  { %1009 = vmatprep.subr.bf16.mxu0 %v2076_v34  ;;  %1050 = vmatprep.subr.bf16.mxu1 %v2078_v35  ;;  %v120_v34 = vld [vmem:[#allocation9 + $0x18] sm:$0xff]  ;;  %v2108_v37 = vcombine.high %v119_v31, %v123_v32  ;;  %v2107_v39 = vcombine.low %v119_v31, %v123_v32  ;;  %v2285_v26 = vld [vmem:[#allocation12 + $0x160] ss:$16 sps:$4 sm:$0xff]  }
  0xb9   :  { %v124_v35 = vld [vmem:[#allocation9 + $0x38] sm:$0xff]  ;;  %v2291_v32 = vld [vmem:[#allocation12 + $0x140] ss:$16 sps:$4 sm:$0xff]  }
  0xba   :  { %v2110_v38 = vcombine.high %v120_v34, %v124_v35  ;;  %v2296_v31 = vld [vmem:[#allocation12 + $0x14c] ss:$16 sps:$4 sm:$0xff]  }
  0xbb   :  { %1010 = vmatpush2.bf16.msra.mxu0 %v2075_v40  ;;  %1051 = vmatpush2.bf16.msra.mxu1 %v2077_v41  ;;  %v2109_v40 = vcombine.low %v120_v34, %v124_v35  ;;  %v2215_v41 = vld [vmem:[#allocation12 + $0xe4] ss:$16 sps:$4 sm:$0xff]   ;;  %v2302_v35 = vld [vmem:[#allocation12 + $0x12c] ss:$16 sps:$4 sm:$0xff]  }
  0xbc   :  { %1011 = vmatprep.subr.bf16.mxu0 %v2068_v57  ;;  %1052 = vmatprep.subr.bf16.mxu1 %v2070_v42  ;;  %v2218_v57 = vld [vmem:[#allocation12 + $0xec] ss:$16 sps:$4 sm:$0xff]   ;;  %v2213_v42 = vld [vmem:[#allocation12 + $0xe0] ss:$16 sps:$4 sm:$0xff]   ;;  %v2299_v34 = vld [vmem:[#allocation12 + $0x124] ss:$16 sps:$4 sm:$0xff]  }
  0xbf   :  { %1012 = vmatpush2.bf16.msra.mxu0 %v2067_v47  ;;  %1053 = vmatpush2.bf16.msra.mxu1 %v2069_v48  ;;  %v2222_v47 = vld [vmem:[#allocation12 + $0xc8] ss:$16 sps:$4 sm:$0xff]   ;;  %v2227_v48 = vld [vmem:[#allocation12 + $0xa4] ss:$16 sps:$4 sm:$0xff]  }
  0xc0   :  { %1013 = vmatprep.subr.bf16.mxu0 %v2060_v49  ;;  %1054 = vmatprep.subr.bf16.mxu1 %v2062_v50  ;;  %v2230_v49 = vld [vmem:[#allocation12 + $0xac] ss:$16 sps:$4 sm:$0xff]   ;;  %v2225_v50 = vld [vmem:[#allocation12 + $0xa0] ss:$16 sps:$4 sm:$0xff]  }
  0xc3   :  { %1014 = vmatpush2.bf16.msra.mxu0 %v2059_v55  ;;  %1055 = vmatpush2.bf16.msra.mxu1 %v2061_v56  ;;  %v2234_v55 = vld [vmem:[#allocation12 + $0x88] ss:$16 sps:$4 sm:$0xff]   ;;  %v2239_v56 = vld [vmem:[#allocation12 + $0x64] ss:$16 sps:$4 sm:$0xff]  }
  0xc4   :  { %1015 = vmatprep.subr.bf16.mxu0 %v2052_v58  ;;  %1056 = vmatprep.subr.bf16.mxu1 %v2054_v59  ;;  %v2242_v58 = vld [vmem:[#allocation12 + $0x6c] ss:$16 sps:$4 sm:$0xff]   ;;  %v2237_v59 = vld [vmem:[#allocation12 + $0x60] ss:$16 sps:$4 sm:$0xff]  }
  0xc7   :  { %1016 = vmatpush2.bf16.msra.mxu0 %v2051_v0  ;;  %1057 = vmatpush2.bf16.msra.mxu1 %v2053_v1  ;;  %v2246_v0 = vld [vmem:[#allocation12 + $0x48] ss:$16 sps:$4 sm:$0xff]   ;;  %v2251_v1 = vld [vmem:[#allocation12 + $0x24] ss:$16 sps:$4 sm:$0xff]  }
  0xc8   :  { %1017 = vmatprep.subr.bf16.mxu0 %v2044_v2  ;;  %1058 = vmatprep.subr.bf16.mxu1 %v2046_v3  ;;  %v2254_v2 = vld [vmem:[#allocation12 + $0x2c] ss:$16 sps:$4 sm:$0xff]   ;;  %v2249_v3 = vld [vmem:[#allocation12 + $0x20] ss:$16 sps:$4 sm:$0xff]  }
  0xcb   :  { %1018 = vmatpush2.bf16.msra.mxu0 %v2043_v8  ;;  %1059 = vmatpush2.bf16.msra.mxu1 %v2045_v9  ;;  %v2258_v8 = vld [vmem:[#allocation12 + $0x8] ss:$16 sps:$4 sm:$0xff]   ;;  %v2263_v9 = vld [vmem:[#allocation12 + $0x1e4] ss:$16 sps:$4 sm:$0xff]  }
  0xcc   :  { %1165 = vmatprep.subr.bf16.mxu0 %v2112_v10  ;;  %1206 = vmatprep.subr.bf16.mxu1 %v2114_v11  ;;  %v2266_v10 = vld [vmem:[#allocation12 + $0x1ec] ss:$16 sps:$4 sm:$0xff]   ;;  %v2261_v11 = vld [vmem:[#allocation12 + $0x1e0] ss:$16 sps:$4 sm:$0xff]  }
  0xce   :  { %1020 = vmatmul.mubr.bf16.vlgmr.msra.gmra.mxu0 %v2630_v14  ;;  %1061 = vmatmul.mubr.bf16.vlgmr.msra.gmra.mxu1 %v2630_v14  ;;  %v2115_v14 = vcombine.low %v127_v21, %v131_v22  ;;  %v2276_v21 = vld [vmem:[#allocation12 + $0x1a8] ss:$16 sps:$4 sm:$0xff]   ;;  %v2281_v22 = vld [vmem:[#allocation12 + $0x184] ss:$16 sps:$4 sm:$0xff]  }
  0xcf   :  { %1166 = vmatpush1.bf16.msra.mxu0 %v2111_v17  ;;  %1207 = vmatpush1.bf16.msra.mxu1 %v2113_v18  ;;  %v2270_v17 = vld [vmem:[#allocation12 + $0x1c8] ss:$16 sps:$4 sm:$0xff]   ;;  %v2275_v18 = vld [vmem:[#allocation12 + $0x1a4] ss:$16 sps:$4 sm:$0xff]  }
  0xd0   :  { %1167 = vmatprep.subr.bf16.mxu0 %v2104_v19  ;;  %1208 = vmatprep.subr.bf16.mxu1 %v2106_v20  ;;  %v2278_v19 = vld [vmem:[#allocation12 + $0x1ac] ss:$16 sps:$4 sm:$0xff]   ;;  %v2273_v20 = vld [vmem:[#allocation12 + $0x1a0] ss:$16 sps:$4 sm:$0xff]  }
  0xd1   :  { %1185 = vmatprep.mubr.bf16.mxu0 %v2543_v29  ;;  %1226 = vmatprep.mubr.bf16.mxu1 %v2543_v29 }
  0xd3   :  { %1168 = vmatpush1.bf16.msra.mxu0 %v2103_v25  ;;  %1209 = vmatpush1.bf16.msra.mxu1 %v2105_v27  ;;  %v2282_v25 = vld [vmem:[#allocation12 + $0x188] ss:$16 sps:$4 sm:$0xff]   ;;  %v2287_v27 = vld [vmem:[#allocation12 + $0x164] ss:$16 sps:$4 sm:$0xff]  }
  0xd4   :  { %1247 = vmatprep.subr.bf16.mxu0 %v2116_v28  ;;  %1288 = vmatprep.subr.bf16.mxu1 %v2118_v30  ;;  %v2288_v28 = vld [vmem:[#allocation12 + $0x168] ss:$16 sps:$4 sm:$0xff]   ;;  %v2293_v30 = vld [vmem:[#allocation12 + $0x144] ss:$16 sps:$4 sm:$0xff]  }
  0xd6   :  { %2119 = vmatmul.mubr.msk.bf16.vlgmr.msra.gmra.mxu0 %vm1149_vm0, %v116_v33  ;;  %2120 = vmatmul.mubr.msk.bf16.vlgmr.msra.gmra.mxu1 %vm1149_vm0, %v116_v33 }
  0xd7   :  { %1248 = vmatpush1.bf16.msra.mxu0 %v2115_v14  ;;  %1289 = vmatpush1.bf16.msra.mxu1 %v2117_v36  ;;  %v2297_v14 = vld [vmem:[#allocation12 + $0x120] ss:$16 sps:$4 sm:$0xff]   ;;  %v2300_v36 = vld [vmem:[#allocation12 + $0x128] ss:$16 sps:$4 sm:$0xff]  }
  0xd8   :  { %1249 = vmatprep.subr.bf16.mxu0 %v2108_v37  ;;  %1290 = vmatprep.subr.bf16.mxu1 %v2110_v38  ;;  %v2305_v37 = vld [vmem:[#allocation12 + $0x104] ss:$16 sps:$4 sm:$0xff]   ;;  %v2308_v38 = vld [vmem:[#allocation12 + $0x10c] ss:$16 sps:$4 sm:$0xff]  }
  0xd9   :  { %1267 = vmatprep.mubr.bf16.mxu0 %v2543_v29  ;;  %1308 = vmatprep.mubr.bf16.mxu1 %v2543_v29  ;;  %v2290_v29 = vld [vmem:[#allocation12 + $0x16c] ss:$16 sps:$4 sm:$0xff]  }
  0xdb   :  { %1250 = vmatpush1.bf16.msra.mxu0 %v2107_v39  ;;  %1291 = vmatpush1.bf16.msra.mxu1 %v2109_v40  ;;  %v2303_v40 = vld [vmem:[#allocation12 + $0x100] ss:$16 sps:$4 sm:$0xff]  }
  0xdc   :  { %1844 = vmatprep.subr.bf16.mxu0 %v2215_v41  ;;  %1885 = vmatprep.subr.bf16.mxu1 %v2218_v57  ;;  %v2306_v41 = vld [vmem:[#allocation12 + $0x108] ss:$16 sps:$4 sm:$0xff]  }
  0xde   :  { %2121 = vmatmul.mubr.msk.bf16.vlgmr.msra.gmra.mxu0 %vm1149_vm0, %v116_v33  ;;  %2122 = vmatmul.mubr.msk.bf16.vlgmr.msra.gmra.mxu1 %vm1149_vm0, %v116_v33  ;;  %v2294_v33 = vld [vmem:[#allocation12 + $0x148] ss:$16 sps:$4 sm:$0xff]  }
  0xdf   :  { %1845 = vmatpush1.bf16.msra.mxu0 %v2213_v42  ;;  %1886 = vmatpush1.bf16.msra.mxu1 %v2216_v43 }
  0xe0   :  { %1846 = vmatprep.subr.bf16.mxu0 %v2221_v44  ;;  %1887 = vmatprep.subr.bf16.mxu1 %v2224_v45 }
  0xe3   :  { %1847 = vmatpush1.bf16.msra.mxu0 %v2219_v46  ;;  %1888 = vmatpush1.bf16.msra.mxu1 %v2222_v47 }
  0xe4   :  { %1848 = vmatprep.subr.bf16.mxu0 %v2227_v48  ;;  %1889 = vmatprep.subr.bf16.mxu1 %v2230_v49  ;;  %v1319_v48 = vlaneseq }
  0xe6   :  { %v2642_v49 = vshrl.u32 %v1319_v48, 7 }
  0xe7   :  { %1849 = vmatpush1.bf16.msra.mxu0 %v2225_v50  ;;  %1890 = vmatpush1.bf16.msra.mxu1 %v2228_v51 }
  0xe8   :  { %1850 = vmatprep.subr.bf16.mxu0 %v2233_v52  ;;  %1891 = vmatprep.subr.bf16.mxu1 %v2236_v53 }
  0xeb   :  { %1851 = vmatpush1.bf16.msra.mxu0 %v2231_v54  ;;  %1892 = vmatpush1.bf16.msra.mxu1 %v2234_v55  ;;  %v1321_v54 = vsub.s32 0, %v2642_v49 }
  0xec   :  { %1852 = vmatprep.subr.bf16.mxu0 %v2239_v56  ;;  %1893 = vmatprep.subr.bf16.mxu1 %v2242_v58  ;;  %v1317_v56 = vld [vmem:[%s2688_s5] sm:$0xff]  ;;  %v1329_v58 = vsub.s32 2, %v2642_v49  ;;  %s2544_s5 = smov [#allocation15]  }
  0xed   :  { %s1946_s21 = sshll.u32 %s2544_s5, 4  ;;  %s1947_s21 = int_to_ptr.vmem [resolvable:$true] %s1946_s21 }
  0xee   :  { %s2461_s22 = scalar_lea.vmem %s1947_s21, 256  ;;  %p2466_p3 = scmp.lt.s32.totalorder %s1947_s21, %s1947_s21 }
  0xef   :  { %1853 = vmatpush1.bf16.msra.mxu0 %v2237_v59  ;;  %1894 = vmatpush1.bf16.msra.mxu1 %v2240_v60  ;;  %v1325_v60 = vsub.s32 1, %v2642_v49  ;;  %p2462_p2 = scmp.ne.s32.totalorder %s1947_s21, %s2461_s22  ;;  %p2467_p4 = scmp.lt.s32.totalorder %s2461_s22, %s2461_s22 }
  0xf0   :  { %1854 = vmatprep.subr.bf16.mxu0 %v2245_v61  ;;  %1895 = vmatprep.subr.bf16.mxu1 %v2248_v62  ;;  %v1333_v62 = vsub.s32 3, %v2642_v49 }
  0xf1   :  { %p2468_p5 = por %p2467_p4, %p2466_p3 }
  0xf3   :  { %1855 = vmatpush1.bf16.msra.mxu0 %v2243_v63  ;;  %1896 = vmatpush1.bf16.msra.mxu1 %v2246_v0  ;;  %v1322_v0 = vrot.slane %v1317_v56, %v1321_v54  ;;  %p2469_p6 = pnand %p2468_p5, %p2462_p2 }
  0xf4   :  { %1856 = vmatprep.subr.bf16.mxu0 %v2251_v1  ;;  %1897 = vmatprep.subr.bf16.mxu1 %v2254_v2  ;;  %v1330_v2 = vrot.slane %v1317_v56, %v1329_v58 }
  0xf7   :  { %1857 = vmatpush1.bf16.msra.mxu0 %v2249_v3  ;;  %1898 = vmatpush1.bf16.msra.mxu1 %v2252_v4 }
  0xf8   :  { %1858 = vmatprep.subr.bf16.mxu0 %v2257_v5  ;;  %1899 = vmatprep.subr.bf16.mxu1 %v2260_v6  ;;  %v1326_v5 = vrot.slane %v1317_v56, %v1325_v60 }
  0xfb   :  { %1859 = vmatpush1.bf16.msra.mxu0 %v2255_v7  ;;  %1900 = vmatpush1.bf16.msra.mxu1 %v2258_v8  ;;  %v1334_v8 = vrot.slane %v1317_v56, %v1333_v62 }
  0xfc   :  { %1860 = vmatprep.subr.bf16.mxu0 %v2263_v9  ;;  %1901 = vmatprep.subr.bf16.mxu1 %v2266_v10 }
  0xff   :  { %1861 = vmatpush2.bf16.msra.mxu0 %v2261_v11  ;;  %1902 = vmatpush2.bf16.msra.mxu1 %v2264_v12 }
 0x100   :  { %1862 = vmatprep.subr.bf16.mxu0 %v2269_v13  ;;  %1903 = vmatprep.subr.bf16.mxu1 %v2272_v15 }
 0x103   :  { %1863 = vmatpush2.bf16.msra.mxu0 %v2267_v16  ;;  %1904 = vmatpush2.bf16.msra.mxu1 %v2270_v17 }
 0x104   :  { %1864 = vmatprep.subr.bf16.mxu0 %v2275_v18  ;;  %1905 = vmatprep.subr.bf16.mxu1 %v2278_v19  ;;  %v1345_v19 = vsub.s32 6, %v2642_v49 }
 0x107   :  { %1865 = vmatpush2.bf16.msra.mxu0 %v2273_v20  ;;  %1906 = vmatpush2.bf16.msra.mxu1 %v2276_v21 }
 0x108   :  { %1866 = vmatprep.subr.bf16.mxu0 %v2281_v22  ;;  %1907 = vmatprep.subr.bf16.mxu1 %v2284_v23  ;;  %v1349_v23 = vsub.s32 7, %v2642_v49 }
 0x10b   :  { %1867 = vmatpush2.bf16.msra.mxu0 %v2279_v24  ;;  %1908 = vmatpush2.bf16.msra.mxu1 %v2282_v25 }
 0x10c   :  { %1868 = vmatprep.subr.bf16.mxu0 %v2287_v27  ;;  %1909 = vmatprep.subr.bf16.mxu1 %v2290_v29  ;;  %v1341_v29 = vsub.s32 5, %v2642_v49 }
 0x10f   :  { %1869 = vmatpush2.bf16.msra.mxu0 %v2285_v26  ;;  %1910 = vmatpush2.bf16.msra.mxu1 %v2288_v28  ;;  %v1337_v26 = vsub.s32 4, %v2642_v49 }
 0x110   :  { %1870 = vmatprep.subr.bf16.mxu0 %v2293_v30  ;;  %1911 = vmatprep.subr.bf16.mxu1 %v2296_v31  ;;  %v1346_v31 = vrot.slane %v1317_v56, %v1345_v19 }
 0x113   :  { %1871 = vmatpush2.bf16.msra.mxu0 %v2291_v32  ;;  %1912 = vmatpush2.bf16.msra.mxu1 %v2294_v33 }
 0x114   :  { %1872 = vmatprep.subr.bf16.mxu0 %v2299_v34  ;;  %1913 = vmatprep.subr.bf16.mxu1 %v2302_v35  ;;  %v1350_v34 = vrot.slane %v1317_v56, %v1349_v23 }
 0x117   :  { %1873 = vmatpush2.bf16.msra.mxu0 %v2297_v14  ;;  %1914 = vmatpush2.bf16.msra.mxu1 %v2300_v36  ;;  %v1338_v14 = vrot.slane %v1317_v56, %v1337_v26 }
 0x118   :  { %1874 = vmatprep.subr.bf16.mxu0 %v2305_v37  ;;  %1915 = vmatprep.subr.bf16.mxu1 %v2308_v38  ;;  %v1342_v38 = vrot.slane %v1317_v56, %v1341_v29 }
 0x11b   :  { %1875 = vmatpush2.bf16.msra.mxu0 %v2303_v40  ;;  %1916 = vmatpush2.bf16.msra.mxu1 %v2306_v41 }
 0x14e   :  { %v939_v39 = vpop.f32.mrf.mxu0  ;;  %v980_v57 = vpop.f32.mrf.mxu1 }
 0x150   :  { %v941_v42 = vpop.f32.mrf.mxu0  ;;  %v982_v43 = vpop.f32.mrf.mxu1 }
 0x152   :  { %v943_v44 = vpop.f32.mrf.mxu0  ;;  %v984_v45 = vpop.f32.mrf.mxu1 }
 0x154   :  { %v944_v46 = vpop.f32.mrf.mxu0  ;;  %v985_v47 = vpop.f32.mrf.mxu1 }
 0x18e   :  { %v1021_v50 = vpop.f32.mrf.mxu0  ;;  %v1062_v51 = vpop.f32.mrf.mxu1 }
 0x190   :  { %v1023_v52 = vpop.f32.mrf.mxu0  ;;  %v1064_v53 = vpop.f32.mrf.mxu1 }
 0x192   :  { %v1025_v55 = vpop.f32.mrf.mxu0  ;;  %v1066_v59 = vpop.f32.mrf.mxu1 }
 0x194   :  { %v1026_v61 = vpop.f32.mrf.mxu0  ;;  %v1067_v63 = vpop.f32.mrf.mxu1 }
 0x196   :  { %v1187_v1 = vpop.f32.mrf.mxu0  ;;  %v1228_v4 = vpop.f32.mrf.mxu1 }
 0x197   :  { %v1188_v3 = vadd.f32 %v1187_v1, %v939_v39  ;;  %v1229_v6 = vadd.f32 %v1228_v4, %v980_v57 }
 0x198   :  { %v1189_v7 = vpop.f32.mrf.mxu0  ;;  %v1230_v11 = vpop.f32.mrf.mxu1 }
 0x199   :  { %v1359_v9 = vadd.f32 %v1322_v0, %v1188_v3  ;;  %v1190_v10 = vadd.f32 %v1189_v7, %v941_v42  ;;  %v1361_v12 = vadd.f32 %v1330_v2, %v1229_v6  ;;  %v1231_v13 = vadd.f32 %v1230_v11, %v982_v43  ;;  %v1405_v3 = vld [vmem:[#allocation8] sm:$0xff] }
 0x19a   :  { %v1191_v15 = vpop.f32.mrf.mxu0  ;;  %v1232_v18 = vpop.f32.mrf.mxu1 }
 0x19b   :  { %v2123_v16 = vmul.f32 -1.442695, %v1359_v9  ;;  %v1360_v17 = vadd.f32 %v1326_v5, %v1190_v10  ;;  %v2125_v20 = vmul.f32 -1.442695, %v1361_v12  ;;  %v1362_v21 = vadd.f32 %v1334_v8, %v1231_v13  ;;  %v1406_v8 = vld [vmem:[#allocation8 + $0x8] sm:$0xff] }
 0x19c   :  { %v1192_v22 = vpop.f32.mrf.mxu0  ;;  %v1233_v25 = vpop.f32.mrf.mxu1 }
 0x19d   :  { %2309 = vpow2.f32 %v2123_v16  ;;  %v2124_v24 = vmul.f32 -1.442695, %v1360_v17  ;;  %v2126_v27 = vmul.f32 -1.442695, %v1362_v21 }
 0x19e   :  { %2311 = vpow2.f32 %v2125_v20  ;;  %v1269_v28 = vpop.f32.mrf.mxu0  ;;  %v1310_v30 = vpop.f32.mrf.mxu1 }
 0x19f   :  { %2313 = vpow2.f32 %v2124_v24  ;;  %v1311_v32 = vadd.f32 %v1310_v30, %v1062_v51  ;;  %v1270_v35 = vadd.f32 %v1269_v28, %v1021_v50 }
 0x1a0   :  { %2315 = vpow2.f32 %v2126_v27  ;;  %v1271_v33 = vpop.f32.mrf.mxu0  ;;  %v1312_v36 = vpop.f32.mrf.mxu1 }
 0x1a1   :  { %v1272_v37 = vadd.f32 %v1271_v33, %v1023_v52  ;;  %v1313_v39 = vadd.f32 %v1312_v36, %v1064_v53  ;;  %v1365_v41 = vadd.f32 %v1346_v31, %v1311_v32  ;;  %v1363_v44 = vadd.f32 %v1338_v14, %v1270_v35 }
 0x1a2   :  { %v1273_v40 = vpop.f32.mrf.mxu0  ;;  %v1314_v57 = vpop.f32.mrf.mxu1 }
 0x1a3   :  { %v1366_v42 = vadd.f32 %v1350_v34, %v1313_v39  ;;  %v1364_v46 = vadd.f32 %v1342_v38, %v1272_v37  ;;  %v2127_v47 = vmul.f32 -1.442695, %v1365_v41  ;;  %2317 = vtanh.f32 %v1363_v44 }
 0x1a4   :  { %v1274_v43 = vpop.f32.mrf.mxu0  ;;  %v1315_v45 = vpop.f32.mrf.mxu1 }
 0x1a5   :  { %v2128_v48 = vmul.f32 -1.442695, %v1366_v42  ;;  %2319 = vtanh.f32 %v1364_v46 }
 0x1a6   :  { %2321 = vpow2.f32 %v2127_v47 }
 0x1a7   :  { %2323 = vpow2.f32 %v2128_v48 }
 0x1aa   :  { %v2310_v51 = vpop.eup %2309 }
 0x1ab   :  { %v2312_v55 = vpop.eup %2311  ;;  %v1373_v50 = vadd.f32 1.0, %v2310_v51 }
 0x1ac   :  { %v2314_v59 = vpop.eup %2313  ;;  %v1385_v52 = vadd.f32 1.0, %v2312_v55 }
 0x1ad   :  { %v2316_v53 = vpop.eup %2315  ;;  %2325 = vrcp.f32 %v1373_v50  ;;  %v1374_v56 = vadd.f32 1.0, %v2314_v59 }
 0x1ae   :  { %2327 = vrcp.f32 %v1385_v52  ;;  %v1386_v61 = vadd.f32 1.0, %v2316_v53 }
 0x1af   :  { %2329 = vrcp.f32 %v1374_v56 }
 0x1b0   :  { %2331 = vrcp.f32 %v1386_v61  ;;  %v2318_v63 = vpop.eup %2317 }
 0x1b2   :  { %v2320_v0 = vpop.eup %2319 }
 0x1b3   :  { %v2322_v1 = vpop.eup %2321 }
 0x1b4   :  { %v2324_v2 = vpop.eup %2323  ;;  %v1399_v7 = vadd.f32 1.0, %v2322_v1 }
 0x1b5   :  { %v1400_v13 = vadd.f32 1.0, %v2324_v2 }
 0x1b6   :  { %2333 = vrcp.f32 %v1399_v7 }
 0x1ba   :  { %v2326_v4 = vpop.eup %2325 }
 0x1bb   :  { %v2328_v5 = vpop.eup %2327  ;;  %v1409_v6 = vmul.f32 %v2326_v4, %v2318_v63 }
 0x1bc   :  { %v2330_v9 = vpop.eup %2329  ;;  %v1407_v10 = vmul.f32 %v2328_v5, %v1405_v3 }
 0x1bd   :  { %v2332_v11 = vpop.eup %2331  ;;  %v1410_v12 = vmul.f32 %v2330_v9, %v2320_v0 }
 0x1be   :  { %v1411_v15 = vadd.f32 %v1409_v6, %v1407_v10  ;;  %v1408_v16 = vmul.f32 %v2332_v11, %v1406_v8 }
 0x1c0   :  { %2335 = vtanh.f32 %v1411_v15  ;;  %1417 = vst [vmem:[#allocation17] sm:$0xff] %v1411_v15  ;;  %v1412_v17 = vadd.f32 %v1410_v12, %v1408_v16 }
 0x1c1   :  { %2337 = vrcp.f32 %v1400_v13 }
 0x1c2   :  { %1418 = vst [vmem:[#allocation17 + $0x8] sm:$0xff] %v1412_v17  ;;  %2339 = vtanh.f32 %v1412_v17 }
 0x1c3   :  { %v2334_v18 = vpop.eup %2333 }
 0x1cd   :  { %v2336_v19 = vpop.eup %2335 }
 0x1ce   :  { %v2338_v20 = vpop.eup %2337  ;;  %v1415_v21 = vmul.f32 %v2336_v19, %v2334_v18 }
 0x1cf   :  { %v2340_v22 = vpop.eup %2339 }
 0x1d0   :  { %v1416_v23 = vmul.f32 %v2340_v22, %v2338_v20  ;;  %1419 = vst [vmem:[#allocation15] sm:$0xff] %v1415_v21  ;;  %v2197_v25 = vpack.c.bf16 %v1415_v21, %v1415_v21 }
 0x1d2   :  { %v2198_v24 = vpack.c.bf16 %v1416_v23, %v1416_v23  ;;  %1420 = vst [vmem:[#allocation15 + $0x8] sm:$0xff] %v1416_v23 }
 0x1d4   :  { %1876 = vmatprep.mubr.bf16.mxu0 %v2198_v24  ;;  %1917 = vmatprep.mubr.bf16.mxu1 %v2198_v24 }
 0x1d5   :  { %1877 = vmatmul.mubr.bf16.vlgmr.msra.gmra.mxu0 %v2197_v25  ;;  %1918 = vmatmul.mubr.bf16.vlgmr.msra.gmra.mxu1 %v2197_v25 }
 0x1d6   :  { %2472 = shalt.err (!%p2469_p6)
}
 0x1d7   :  { %1949 = dma.vmem_to_hbm [thread:$0]  %s1947_s21, 256, %s2692_s9, [#allocation16]  }
 0x1d8   :  { %s2545_s27 = smov [#allocation17]  }
 0x1d9   :  { %s1956_s1 = sshll.u32 %s2545_s27, 4  ;;  %s1957_s1 = int_to_ptr.vmem [resolvable:$true] %s1956_s1 }
 0x1da   :  { %s2481_s28 = scalar_lea.vmem %s1957_s1, 256  ;;  %p2486_p8 = scmp.lt.s32.totalorder %s1957_s1, %s1957_s1 }
 0x1db   :  { %p2482_p7 = scmp.ne.s32.totalorder %s1957_s1, %s2481_s28  ;;  %p2487_p9 = scmp.lt.s32.totalorder %s2481_s28, %s2481_s28 }
 0x1dd   :  { %p2488_p10 = por %p2487_p9, %p2486_p8 }
 0x1df   :  { %p2489_p11 = pnand %p2488_p10, %p2482_p7 }
 0x1e1   :  { %2492 = shalt.err (!%p2489_p11)
}
 0x1e2   :  { %1959 = dma.vmem_to_hbm [thread:$0]  %s1957_s1, 256, %s2693_s10, [#allocation16]   ;;  %v1495_v26 = vld [vmem:[%s2690_s7] sm:$0xf] }
 0x1e3   :  { %v1500_v27 = vrot.slane %v1495_v26, %v1321_v54  ;;  %v1508_v28 = vrot.slane %v1495_v26, %v1329_v58  ;;  %v1504_v29 = vrot.slane %v1495_v26, %v1325_v60  ;;  %v1512_v30 = vrot.slane %v1495_v26, %v1333_v62  ;;  %s2546_s9 = smov [#allocation14]  }
 0x1e4   :  { %s1936_s10 = sshll.u32 %s2546_s9, 4  ;;  %s1937_s10 = int_to_ptr.vmem [resolvable:$true] %s1936_s10 }
 0x1e5   :  { %s2501_s7 = scalar_lea.vmem %s1937_s10, 512  ;;  %p2506_p13 = scmp.lt.s32.totalorder %s1937_s10, %s1937_s10 }
 0x1e6   :  { %p2502_p12 = scmp.ne.s32.totalorder %s1937_s10, %s2501_s7  ;;  %p2507_p0 = scmp.lt.s32.totalorder %s2501_s7, %s2501_s7 }
 0x1e8   :  { %p2508_p1 = por %p2507_p0, %p2506_p13 }
 0x1ea   :  { %p2509_p2 = pnand %p2508_p1, %p2502_p12 }
 0x295   :  { %v1878_v31 = vpop.f32.mrf.mxu0  ;;  %v1919_v32 = vpop.f32.mrf.mxu1 }
 0x296   :  { %v1879_v33 = vadd.f32 %v1878_v31, %v1500_v27  ;;  %v1920_v34 = vadd.f32 %v1919_v32, %v1508_v28 }
 0x297   :  { %v1880_v35 = vpop.f32.mrf.mxu0  ;;  %v1921_v14 = vpop.f32.mrf.mxu1 }
 0x298   :  { %1926 = vst [vmem:[#allocation14] sm:$0xff] %v1879_v33  ;;  %1928 = vst [vmem:[#allocation14 + $0x10] sm:$0xff] %v1920_v34  ;;  %v1881_v54 = vadd.f32 %v1880_v35, %v1504_v29  ;;  %v1922_v36 = vadd.f32 %v1921_v14, %v1512_v30 }
 0x299   :  { %v1882_v58 = vpop.f32.mrf.mxu0  ;;  %v1923_v37 = vpop.f32.mrf.mxu1 }
 0x29a   :  { %1927 = vst [vmem:[#allocation14 + $0x8] sm:$0xff] %v1881_v54  ;;  %1929 = vst [vmem:[#allocation14 + $0x18] sm:$0xff] %v1922_v36 }
 0x29b   :  { %v1883_v60 = vpop.f32.mrf.mxu0  ;;  %v1924_v49 = vpop.f32.mrf.mxu1 }
 0x29c   :  { %2512 = shalt.err (!%p2509_p2)
}
 0x29d   :  { %1939 = dma.vmem_to_hbm [thread:$0]  %s1937_s10, 512, %s2691_s8, [#allocation5]  }
 0x29e   :  { %2529 = dma.done.wait [#allocation5], 512  }
 0x29f   :  { %2530 = vsyncadd [#allocation5], 4294966784 }
 0x2a0   :  { %2531 = dma.done.wait [#allocation16], 512  }
 0x2a1   :  { %2532 = vsyncadd [#allocation16], 4294966784 }
 0x2a2   :  { %1969 = vsyncpa [#allocation4], 1 }
 0x2a3   :  { %1970 = vsyncpa [#allocation7], 1 }
 0x2a4   :  { %1971 = vsyncpa [#allocation10], 1 }
 0x2a5   :  { %1972 = vsyncpa [#allocation13], 1 }
 0x2a6   :  { %1973 = vsyncpa [#allocation5], 1 }
 0x2a7   :  { %1974 = vsyncpa [#allocation16], 1 }

</bundles_post_ra>
